<compile_context>
chip_gen: v6e
topology: v6e:2x2x1
jax: 0.10.0
libtpu: 0.0.40
codegen_flags: <defaults>
</compile_context>

<pallas_src>
import jax
import jax.numpy as jnp
from jax.experimental import pallas as pl
from jax.experimental.pallas import tpu as pltpu


def _temp_scale_kernel(temp_ref, logits_ref, out_ref):
    # temp_ref: SMEM scalar (shape (1,)); logits_ref/out_ref: VMEM tiles.
    # One scalar reciprocal + an f32 VALU multiply per tile; cast on store.
    inv_t = 1.0 / temp_ref[0].astype(jnp.float32)
    out_ref[...] = (logits_ref[...].astype(jnp.float32) * inv_t).astype(out_ref.dtype)


def _round_down(x: int, m: int) -> int:
    return (x // m) * m


def _round_up(x: int, m: int) -> int:
    return ((x + m - 1) // m) * m


def _flat_width(total: int) -> int:
    """Largest lane-dense width L (multiple of 128, up to 8192) dividing total."""
    q = total // 128
    for m in (64, 32, 16, 8, 4, 2, 1):
        if q % m == 0:
            return 128 * m
    return 128


def _choose_tiles(N: int, C: int, itemsize: int, budget_bytes: int):
    """Pick lane-dense, VMEM-budgeted tiles.

    - Lane (class) tile: full C whenever one sublane-pack strip of full C fits
      the block budget (unmasked full-lane stores, no column edge tiles);
      otherwise a multiple of 128.
    - Sublane (row) tile: multiple of the sublane-pack size (8 f32 / 16 bf16 /
      32 int8), budgeted per block, never rounded past N, and adjusted so the
      row-block count is >= 2 and even when small (v7x has 2 TCs sharing the
      'parallel' grid axis; v5e/v6e are unaffected).
    """
    sub = max(8, 32 // max(itemsize, 1))
    lane = 128

    # lane (class) tile
    if C <= lane or sub * C * itemsize <= budget_bytes:
        tc = C                                              # full-dim block is always legal
    else:
        tc = max(lane, _round_down(budget_bytes // (sub * itemsize), lane))
        tc = min(tc, max(lane, _round_down(C, lane)))       # lane-dense split of huge C

    # sublane (row) tile, budgeted against VMEM
    tn = max(sub, _round_down(budget_bytes // max(tc * itemsize, 1), sub))
    if tn >= N:
        tn = N                                              # full-dim block, no padded rows

    # keep an even (>= 2) number of row blocks when the count is small
    nb = pl.cdiv(N, tn)
    if nb < 8 and N > sub:
        target = nb + (nb % 2)                              # 1->2, 3->4, 5->6, 7->8
        if target != nb:
            tn = max(sub, _round_up(pl.cdiv(N, target), sub))
            tn = min(tn, N)
    return tn, tc


def temperature_scale(logits: jax.Array, temperature: jax.Array,
                      *, min_pallas_bytes: int = 2 * 1024 * 1024) -> jax.Array:
    """logits: (N, C) float array; temperature: (1,) float array."""
    assert logits.ndim == 2, "expected 2-D logits (batch, classes)"
    N, C = logits.shape
    itemsize = jnp.dtype(logits.dtype).itemsize
    total = N * C

    # For small inputs the pallas_call launch / pipeline warmup dwarfs the
    # work; let XLA fuse a scalar multiply instead.
    if total * itemsize < min_pallas_bytes:
        inv_t = 1.0 / temperature[0].astype(jnp.float32)
        return (logits.astype(jnp.float32) * inv_t).astype(logits.dtype)

    # Awkward class counts: reshape to a lane-dense slab (free layout plumbing
    # for an elementwise op) so every tile is a full-lane unmasked store.
    x = logits
    flattened = False
    if (C % 128 != 0 or C < 128) and (total % 128 == 0):
        L = _flat_width(total)
        x = logits.reshape(total // L, L)
        flattened = True
    Nk, Ck = x.shape

    budget_bytes = 6 * 1024 * 1024                          # per-block; 4 live bufs = 24 MiB
    tn, tc = _choose_tiles(Nk, Ck, itemsize, budget_bytes)
    grid = (pl.cdiv(Nk, tn), pl.cdiv(Ck, tc))

    out = pl.pallas_call(
        _temp_scale_kernel,
        out_shape=jax.ShapeDtypeStruct((Nk, Ck), logits.dtype),
        grid_spec=pltpu.PrefetchScalarGridSpec(
            num_scalar_prefetch=0,
            grid=grid,
            in_specs=[
                pl.BlockSpec(memory_space=pltpu.SMEM),          # temperature scalar
                pl.BlockSpec((tn, tc), lambda i, j: (i, j)),    # logits tile
            ],
            out_specs=pl.BlockSpec((tn, tc), lambda i, j: (i, j)),
        ),
        compiler_params=pltpu.CompilerParams(
            dimension_semantics=("parallel", "parallel"),
            vmem_limit_bytes=48 * 1024 * 1024,               # covers 4x6 MiB buffers on v5e/v6e/v7x
        ),
    )(temperature.astype(jnp.float32), x)

    if flattened:
        out = out.reshape(N, C)
    return out


class TemperatureScaling:
    """JAX mirror of the PyTorch Temperature_scaling module."""

    def __init__(self):
        # nn.Parameter(torch.ones(1) * 1.5) — deterministic init.
        self.temperature = jnp.ones((1,), dtype=jnp.float32) * 1.5

    def __call__(self, logits):
        return temperature_scale(logits, self.temperature)


if __name__ == "__main__":
    key = jax.random.PRNGKey(0)
    k1, k2, k3 = jax.random.split(key, 3)
    model = TemperatureScaling()

    # Case 1: lane-aligned classes (C % 128 == 0) — direct (tn, C) tiling, 2 row blocks.
    logits1 = jax.random.normal(k1, (1024, 768), dtype=jnp.float32)
    out1 = jax.block_until_ready(model(logits1))
    ref1 = logits1 / model.temperature[0]
    assert out1.shape == logits1.shape
    assert jnp.allclose(out1, ref1, atol=1e-5, rtol=1e-5)

    # Case 2: awkward class count (C = 500) — flattened lane-dense slab path.
    logits2 = jax.random.normal(k2, (2048, 500), dtype=jnp.float32)
    out2 = jax.block_until_ready(model(logits2))
    ref2 = logits2 / model.temperature[0]
    assert out2.shape == logits2.shape
    assert jnp.allclose(out2, ref2, atol=1e-5, rtol=1e-5)

    # Case 3: tiny logits — fused XLA scalar-multiply fallback path.
    logits3 = jax.random.normal(k3, (8, 32), dtype=jnp.float32)
    out3 = jax.block_until_ready(model(logits3))
    ref3 = logits3 / model.temperature[0]
    assert out3.shape == logits3.shape
    assert jnp.allclose(out3, ref3, atol=1e-5, rtol=1e-5)

    print("KERNEL_OK")
</pallas_src>

<mosaic_0001>
module attributes {stable_mosaic.version = 11 : i64} {
  func.func @_temp_scale_kernel(%arg0: i32, %arg1: i32, %arg2: memref<1xf32, #tpu.memory_space<smem>>, %arg3: memref<512x768xf32, #tpu.memory_space<vmem>>, %arg4: memref<512x768xf32, #tpu.memory_space<vmem>>) attributes {dimension_semantics = [#tpu.dimension_semantics<parallel>, #tpu.dimension_semantics<parallel>], iteration_bounds = array<i64: 2, 1>, scalar_prefetch = 0 : i64, scratch_operands = 0 : i64, tpu.core_type = #tpu.core_type<tc>, window_params = [{transform_indices = @transform_0, window_bounds = array<i64: 1>}, {transform_indices = @transform_1, window_bounds = array<i64: 512, 768>}, {transform_indices = @transform_2, window_bounds = array<i64: 512, 768>}]} {
    %c0 = arith.constant 0 : index
    %0 = memref.load %arg2[%c0] : memref<1xf32, #tpu.memory_space<smem>>
    %cst = arith.constant 1.000000e+00 : f32
    %1 = arith.divf %cst, %0 : f32
    %c0_0 = arith.constant 0 : index
    %c0_1 = arith.constant 0 : index
    %2 = vector.load %arg3[%c0_0, %c0_1] : memref<512x768xf32, #tpu.memory_space<vmem>>, vector<512x768xf32>
    %3 = vector.broadcast %1 : f32 to vector<512x768xf32>
    %4 = arith.mulf %2, %3 : vector<512x768xf32>
    %c0_2 = arith.constant 0 : index
    %c0_3 = arith.constant 0 : index
    %5 = vector.load %arg4[%c0_2, %c0_3] : memref<512x768xf32, #tpu.memory_space<vmem>>, vector<512x768xf32>
    tpu.vector_store %arg4[%c0_2, %c0_3], %4 {strides = array<i32>} : memref<512x768xf32, #tpu.memory_space<vmem>>, vector<512x768xf32>,
    return
  }
  func.func @transform_0(%arg0: i32, %arg1: i32) -> i32 {
    %c0_i32 = arith.constant 0 : i32
    %c0_i32_0 = arith.constant 0 : i32
    return %c0_i32 : i32
  }
  func.func @transform_1(%arg0: i32, %arg1: i32) -> (i32, i32) {
    %c0_i32 = arith.constant 0 : i32
    return %arg0, %arg1 : i32, i32
  }
  func.func @transform_2(%arg0: i32, %arg1: i32) -> (i32, i32) {
    %c0_i32 = arith.constant 0 : i32
    return %arg0, %arg1 : i32, i32
  }
}

</mosaic_0001>

<bundles_post_ra>
// kernel: tpu_custom_call.1
= control target key start
LH: loop header
LB: loop body
LE: loop exit
PB: predicated region body
PF: predicated region fallthrough
CT: control target
= control target key end

     0   :  { %s3929_s0 = inlined_call_operand.<no memory space> [shape: f32[1], index: 0, kind: input, shape index: {}]   ;;  %s3930_s1 = inlined_call_operand.hbm [shape: f32[1024,768], index: 1, kind: input, shape index: {}]   ;;  %s3931_s2 = inlined_call_operand.hbm [shape: f32[1024,768], index: 2, kind: output, shape index: {}]  }
   0x1   :  { %7 = sst [smem:[#allocation2]] %s3929_s0 }
   0x2   :  { %8 = vsyncpa [#allocation4], 0 }
   0x3   :  { %10 = vsyncpa [#allocation4 + $0x1], 0 }
   0x4   :  { %11 = vsyncpa [#allocation5], 0 }
   0x5   :  { %13 = vsyncpa [#allocation5 + $0x1], 0  ;;  %s1668_s11 = smov 0   ;;  %s1670_s12 = smov 0  }
   0x6   :  { %s1672_s13 = smov 0   ;;  %s1674_s14 = smov 0  }
   0x7   :  { %s1676_s15 = smov 0   ;;  %s1678_s16 = smov 0  }
   0x8 LB: > { %s1447_s0 = sadd.s32 4294967295, %s1642_s16   ;;  %s1448_s17 = sadd.s32 4294967294, %s1642_s16   ;;  %s1642_s16 = sphi %s1678_s16, %s19_s16   ;;  %s1638_s15 = sphi %s1676_s15, %s3942_s15   ;;  %s1634_s14 = sphi %s1674_s14, %s3941_s14   ;;  %s1630_s13 = sphi %s1672_s13, %s3940_s13   ;;  %s1626_s12 = sphi %s1670_s12, %s3939_s12   ;;  %s1622_s11 = sphi %s1668_s11, %s3938_s11  }
   0x9   : > { %s31_s18 = sadd.s32 1, %s1638_s15  ;;  %s61_s19 = sadd.s32 1, %s1630_s13 }
   0xa   : > { %p33_p0 = scmp.ge.s32.totalorder %s31_s18, 2  ;;  %p68_p1 = scmp.ne.s32.totalorder %s1630_s13, %s1626_s12 }
   0xb   : > { %p69_p2 = scmp.eq.s32.totalorder %s1642_s16, 0  ;;  %p74_p3 = scmp.ne.s32.totalorder %s1626_s12, %s1622_s11 }
   0xc   : > { %s3944_s18 = smov (%p33_p0, %s31_s18), 0  ;;  %p75_p5 = scmp.eq.s32.totalorder %s1447_s0, 0 }
   0xd   : > { %p1709_p4 = por %p69_p2, %p68_p1  ;;  %s56_s21 = ssub.s32 %s1638_s15, %s3944_s18 }
   0xe   : > { %p100_p6 = scmp.eq.s32.totalorder %s1447_s0, 1  ;;  %p59_p7 = scmp.eq.s32.totalorder %s56_s21, 0 }
   0xf   : > { %p1715_p8 = por %p75_p5, %p74_p3  ;;  %p106_p10 = scmp.eq.s32.totalorder %s1448_s17, 1 }
  0x10   : > { %p1719_p9 = por %p100_p6, %p68_p1  ;;  %p1478_p13 = scmp.lt.s32.totalorder %s1642_s16, 2 }
  0x11   : > { %s1724_s24 = scalar_select %p59_p7, %s1630_s13, %s61_s19  }
  0x12   : > { %p1726_p11 = por %p106_p10, %p74_p3  ;;  %s129_s26 = sand.u32 1, %s1630_s13  }
  0x13   : > { %s1460_s27 = smul.u32 3072, %s129_s26  ;;  %p1736_p0 = pnand %p1478_p13, %p1709_p4 }
  0x14   : > { %s1461_s28 = smul.u32 49152, %s1638_s15  ;;  %p1454_p1 = scmp.ge.s32.totalorder %s1642_s16, 1 }
  0x15   : > { %s133_s5 = scalar_lea.vmem [#allocation3], %s1460_s27  ;;  %s130_s7 = scalar_lea.sflag [#allocation4], %s129_s26 }
  0x16   : > { %s142_s4 = scalar_lea.hbm %s3930_s1, %s1461_s28  ;;  %s143_s6 = sshll.u32 %s133_s5, 4  ;;  %s144_s6 = int_to_ptr.vmem [resolvable:$true] %s143_s6 }
  0x17   : > { %p1536_p2 = pneg %p1736_p0  ;;  %s1547_s8 = scalar_lea.vmem %s144_s6, 49152 }
  0x18   : > { %p1548_p3 = scmp.ne.s32.totalorder %s144_s6, %s1547_s8  ;;  %s1644_s9 = smov [#allocation3]  }
  0x19   : > { %s1552_s10 = sshll.u32 %s1644_s9, 4  ;;  %s1553_s10 = int_to_ptr.vmem [resolvable:$false] %s1552_s10 }
  0x1a   : > { %p1550_p5 = pnand %p1548_p3, %p1536_p2  ;;  %s1554_s0 = scalar_lea.vmem %s1553_s10, 98304 }
  0x1b   : > { %p1555_p4 = scmp.lt.s32.totalorder %s144_s6, %s1553_s10  ;;  %p1556_p7 = scmp.lt.s32.totalorder %s1554_s0, %s1547_s8 }
  0x1c   : > { %p1551_p6 = pneg %p1550_p5 }
  0x1d   : > { %p1557_p10 = por %p1556_p7, %p1555_p4 }
  0x1f   : > { %p1558_p13 = pnand %p1557_p10, %p1551_p6 }
  0x21   : > { %1561 = shalt.err (!%p1558_p13)
}
  0x22   : > { %s1645_s17 = smov 768   ;;  %s1646_s19 = smov 48  }
  0x23   : > { %1473 = dma.hbm_to_vmem [thread:$0]  (!%p1736_p0), %s142_s4, 49152, %s144_s6, %s130_s7, %s1645_s17, %s1645_s17, %s1646_s19  }
  0x24   : > { %p151_p12 = scmp.lt.s32.totalorder %s1642_s16, 3 }
  0x26   : > { %p152_p2 = pnand %p1454_p1, %p151_p12 }
  0x27   : > { %s1752_s20 = sand.u32 (!%p152_p2), 1, %s1626_s12  }
  0x28   : > { %155 = sbr.rel (%p152_p2) target bundleno = 326 (0x146), region = 28  ;;  %s158_s26 = scalar_lea.sflag (!%p152_p2), [#allocation4], %s1752_s20 }
  0x29   : > { %s1462_s21 = smul.u32 (!%p152_p2), 3072, %s1752_s20 }
  0x2b   : > { %s1758_s27 = scalar_lea.vmem (!%p152_p2), [#allocation3], %s1462_s21 }
  0x2d   : > { %1613 = dma.done.wait (%p1715_p8), %s158_s26, 49152  }
  0x2e   : > { %1615 = vsyncadd (%p1715_p8), %s158_s26, 4294918144  ;;  %s186_s28 = sld [smem:[#allocation2]]  ;;  %v190_v2 = vld [vmem:[%s1758_s27] sm:$0xff]  ;;  %v191_v3 = vld [vmem:[%s1758_s27 + $0x8] sm:$0xff]  ;;  %s1820_s29 = scalar_lea.vmem [#allocation6], %s1462_s21 }
  0x2f   : > { %v192_v4 = vld [vmem:[%s1758_s27 + $0x10] sm:$0xff]  ;;  %v193_v5 = vld [vmem:[%s1758_s27 + $0x18] sm:$0xff]  ;;  %v194_v6 = vld [vmem:[%s1758_s27 + $0x20] sm:$0xff]  ;;  %s1465_s30 = smul.u32 49152, %s1634_s14  ;;  %s1360_s3 = sshll.u32 %s1820_s29, 4  ;;  %s3865_s3 = int_to_ptr.vmem [resolvable:$true] %s1360_s3 }
  0x30   : > { %v195_v7 = vld [vmem:[%s1758_s27 + $0x28] sm:$0xff]  ;;  %v196_v8 = vld [vmem:[%s1758_s27 + $0x30] sm:$0xff]  ;;  %v197_v9 = vld [vmem:[%s1758_s27 + $0x38] sm:$0xff]  ;;  %s1344_s14 = scalar_lea.sflag [#allocation5], %s1752_s20  ;;  %s1562_s7 = scalar_lea.vmem %s3865_s3, 49152 }
  0x31   : > { %v198_v10 = vld [vmem:[%s1758_s27 + $0x40] sm:$0xff]  ;;  %v199_v11 = vld [vmem:[%s1758_s27 + $0x48] sm:$0xff]  ;;  %v200_v12 = vld [vmem:[%s1758_s27 + $0x50] sm:$0xff]  ;;  %s3861_s6 = scalar_lea.hbm %s3931_s2, %s1465_s30  ;;  %p1563_p8 = scmp.ne.s32.totalorder %s3865_s3, %s1562_s7 }
  0x32   : > { %v201_v13 = vld [vmem:[%s1758_s27 + $0x58] sm:$0xff]  ;;  %v202_v14 = vld [vmem:[%s1758_s27 + $0x60] sm:$0xff]  ;;  %v203_v15 = vld [vmem:[%s1758_s27 + $0x68] sm:$0xff]  ;;  %s1647_s8 = smov [#allocation6]  }
  0x33   : > { %v204_v16 = vld [vmem:[%s1758_s27 + $0x70] sm:$0xff]  ;;  %v205_v17 = vld [vmem:[%s1758_s27 + $0x78] sm:$0xff]  ;;  %v206_v18 = vld [vmem:[%s1758_s27 + $0x80] sm:$0xff]  ;;  %p1564_p12 = pnand %p1563_p8, %p1719_p9  ;;  %s1566_s9 = sshll.u32 %s1647_s8, 4  ;;  %s1567_s9 = int_to_ptr.vmem [resolvable:$false] %s1566_s9 }
  0x34   : > { %v187_v0 = vstv %s186_s28  ;;  %v207_v19 = vld [vmem:[%s1758_s27 + $0x88] sm:$0xff]  ;;  %v208_v20 = vld [vmem:[%s1758_s27 + $0x90] sm:$0xff]  ;;  %v209_v21 = vld [vmem:[%s1758_s27 + $0x98] sm:$0xff]  ;;  %s1568_s10 = scalar_lea.vmem %s1567_s9, 98304  ;;  %p1569_p1 = scmp.lt.s32.totalorder %s3865_s3, %s1567_s9 }
  0x35   : > { %1532 = vrcp.f32 %v187_v0  ;;  %v210_v23 = vld [vmem:[%s1758_s27 + $0xa0] sm:$0xff]  ;;  %v211_v24 = vld [vmem:[%s1758_s27 + $0xa8] sm:$0xff]  ;;  %v212_v25 = vld [vmem:[%s1758_s27 + $0xb0] sm:$0xff]  ;;  %p1565_p0 = pneg %p1564_p12  ;;  %p1570_p3 = scmp.lt.s32.totalorder %s1568_s10, %s1562_s7 }
  0x36   : > { %v213_v26 = vld [vmem:[%s1758_s27 + $0xb8] sm:$0xff]  ;;  %v214_v31 = vld [vmem:[%s1758_s27 + $0xc0] sm:$0xff]  ;;  %v215_v32 = vld [vmem:[%s1758_s27 + $0xc8] sm:$0xff] }
  0x37   : > { %v216_v33 = vld [vmem:[%s1758_s27 + $0xd0] sm:$0xff]  ;;  %v217_v34 = vld [vmem:[%s1758_s27 + $0xd8] sm:$0xff]  ;;  %v1803_v39 = vld [vmem:[%s1758_s27 + $0xe0] sm:$0xff]  ;;  %p1571_p5 = por %p1570_p3, %p1569_p1 }
  0x38   : > { %v1806_v40 = vld [vmem:[%s1758_s27 + $0xe8] sm:$0xff]  ;;  %v1809_v41 = vld [vmem:[%s1758_s27 + $0xf0] sm:$0xff]  ;;  %v1812_v42 = vld [vmem:[%s1758_s27 + $0xf8] sm:$0xff] }
  0x39   : > { %v1827_v47 = vld [vmem:[%s1758_s27 + $0x100] sm:$0xff]  ;;  %v1830_v48 = vld [vmem:[%s1758_s27 + $0x108] sm:$0xff]  ;;  %v1833_v49 = vld [vmem:[%s1758_s27 + $0x110] sm:$0xff]  ;;  %p1572_p6 = pnand %p1571_p5, %p1565_p0 }
  0x3a   : > { %v1836_v50 = vld [vmem:[%s1758_s27 + $0x118] sm:$0xff]  ;;  %v1847_v55 = vld [vmem:[%s1758_s27 + $0x120] sm:$0xff]  ;;  %v1850_v56 = vld [vmem:[%s1758_s27 + $0x128] sm:$0xff] }
  0x3b   : > { %v1853_v57 = vld [vmem:[%s1758_s27 + $0x130] sm:$0xff]  ;;  %v1856_v58 = vld [vmem:[%s1758_s27 + $0x138] sm:$0xff]  ;;  %v1867_v63 = vld [vmem:[%s1758_s27 + $0x140] sm:$0xff] }
  0x3c   : > { %v1870_v0 = vld [vmem:[%s1758_s27 + $0x148] sm:$0xff] }
  0x42   : > { %v1533_v1 = vpop.eup %1532 }
  0x43   : > { %1463 = vpush %v1533_v1  ;;  %v1873_v1 = vld [vmem:[%s1758_s27 + $0x150] sm:$0xff] }
  0x74   : > { %s1464_s22 = spop %1463 }
  0x75   : > { %v1784_v22 = vstv %s1464_s22 }
  0x76   : > { %v575_v27 = vmul.f32 %v1784_v22, %v190_v2  ;;  %v576_v28 = vmul.f32 %v1784_v22, %v191_v3  ;;  %v577_v29 = vmul.f32 %v1784_v22, %v192_v4  ;;  %v578_v30 = vmul.f32 %v1784_v22, %v193_v5  ;;  %v1876_v2 = vld [vmem:[%s1758_s27 + $0x158] sm:$0xff] }
  0x77   : > { %v579_v35 = vmul.f32 %v1784_v22, %v194_v6  ;;  %v580_v36 = vmul.f32 %v1784_v22, %v195_v7  ;;  %v581_v37 = vmul.f32 %v1784_v22, %v196_v8  ;;  %v582_v38 = vmul.f32 %v1784_v22, %v197_v9  ;;  %v1887_v7 = vld [vmem:[%s1758_s27 + $0x160] sm:$0xff]  ;;  %v1890_v8 = vld [vmem:[%s1758_s27 + $0x168] sm:$0xff]  ;;  %v1893_v9 = vld [vmem:[%s1758_s27 + $0x170] sm:$0xff] }
  0x78   : > { %v583_v43 = vmul.f32 %v1784_v22, %v198_v10  ;;  %v584_v44 = vmul.f32 %v1784_v22, %v199_v11  ;;  %v585_v45 = vmul.f32 %v1784_v22, %v200_v12  ;;  %v586_v46 = vmul.f32 %v1784_v22, %v201_v13  ;;  %959 = vst [vmem:[%s1820_s29] sm:$0xff] %v575_v27  ;;  %v1896_v10 = vld [vmem:[%s1758_s27 + $0x178] sm:$0xff] }
  0x79   : > { %960 = vst [vmem:[%s1820_s29 + $0x8] sm:$0xff] %v576_v28  ;;  %961 = vst [vmem:[%s1820_s29 + $0x10] sm:$0xff] %v577_v29  ;;  %v587_v51 = vmul.f32 %v1784_v22, %v202_v14  ;;  %v588_v52 = vmul.f32 %v1784_v22, %v203_v15  ;;  %v589_v53 = vmul.f32 %v1784_v22, %v204_v16  ;;  %v1907_v15 = vld [vmem:[%s1758_s27 + $0x180] sm:$0xff]  ;;  %v1910_v16 = vld [vmem:[%s1758_s27 + $0x188] sm:$0xff] }
  0x7a   : > { %962 = vst [vmem:[%s1820_s29 + $0x18] sm:$0xff] %v578_v30  ;;  %v590_v54 = vmul.f32 %v1784_v22, %v205_v17  ;;  %963 = vst [vmem:[%s1820_s29 + $0x20] sm:$0xff] %v579_v35  ;;  %v591_v59 = vmul.f32 %v1784_v22, %v206_v18  ;;  %v592_v60 = vmul.f32 %v1784_v22, %v207_v19  ;;  %v1913_v17 = vld [vmem:[%s1758_s27 + $0x190] sm:$0xff]  ;;  %v1916_v18 = vld [vmem:[%s1758_s27 + $0x198] sm:$0xff] }
  0x7b   : > { %964 = vst [vmem:[%s1820_s29 + $0x28] sm:$0xff] %v580_v36  ;;  %965 = vst [vmem:[%s1820_s29 + $0x30] sm:$0xff] %v581_v37  ;;  %v593_v61 = vmul.f32 %v1784_v22, %v208_v20  ;;  %v594_v62 = vmul.f32 %v1784_v22, %v209_v21  ;;  %v595_v3 = vmul.f32 %v1784_v22, %v210_v23  ;;  %v1940_v27 = vld [vmem:[%s1758_s27 + $0x1b8] sm:$0xff] }
  0x7c   : > { %966 = vst [vmem:[%s1820_s29 + $0x38] sm:$0xff] %v582_v38  ;;  %967 = vst [vmem:[%s1820_s29 + $0x40] sm:$0xff] %v583_v43  ;;  %v596_v4 = vmul.f32 %v1784_v22, %v211_v24  ;;  %v597_v5 = vmul.f32 %v1784_v22, %v212_v25  ;;  %v598_v6 = vmul.f32 %v1784_v22, %v213_v26  ;;  %v1931_v24 = vld [vmem:[%s1758_s27 + $0x1a0] sm:$0xff]  ;;  %v1934_v25 = vld [vmem:[%s1758_s27 + $0x1a8] sm:$0xff] }
  0x7d   : > { %968 = vst [vmem:[%s1820_s29 + $0x48] sm:$0xff] %v584_v44  ;;  %969 = vst [vmem:[%s1820_s29 + $0x50] sm:$0xff] %v585_v45  ;;  %v599_v11 = vmul.f32 %v1784_v22, %v214_v31  ;;  %v600_v12 = vmul.f32 %v1784_v22, %v215_v32  ;;  %v601_v13 = vmul.f32 %v1784_v22, %v216_v33  ;;  %v1937_v26 = vld [vmem:[%s1758_s27 + $0x1b0] sm:$0xff]  ;;  %v1955_v32 = vld [vmem:[%s1758_s27 + $0x1c0] sm:$0xff] }
  0x7e   : > { %970 = vst [vmem:[%s1820_s29 + $0x58] sm:$0xff] %v586_v46  ;;  %971 = vst [vmem:[%s1820_s29 + $0x60] sm:$0xff] %v587_v51  ;;  %v602_v14 = vmul.f32 %v1784_v22, %v217_v34  ;;  %v603_v19 = vmul.f32 %v1784_v22, %v1803_v39  ;;  %v604_v20 = vmul.f32 %v1784_v22, %v1806_v40  ;;  %v1958_v33 = vld [vmem:[%s1758_s27 + $0x1c8] sm:$0xff]  ;;  %v1961_v34 = vld [vmem:[%s1758_s27 + $0x1d0] sm:$0xff] }
  0x7f   : > { %972 = vst [vmem:[%s1820_s29 + $0x68] sm:$0xff] %v588_v52  ;;  %973 = vst [vmem:[%s1820_s29 + $0x70] sm:$0xff] %v589_v53  ;;  %v605_v21 = vmul.f32 %v1784_v22, %v1809_v41  ;;  %v606_v23 = vmul.f32 %v1784_v22, %v1812_v42  ;;  %v607_v28 = vmul.f32 %v1784_v22, %v1827_v47  ;;  %v1964_v35 = vld [vmem:[%s1758_s27 + $0x1d8] sm:$0xff]  ;;  %v1979_v40 = vld [vmem:[%s1758_s27 + $0x1e0] sm:$0xff] }
  0x80   : > { %974 = vst [vmem:[%s1820_s29 + $0x78] sm:$0xff] %v590_v54  ;;  %975 = vst [vmem:[%s1820_s29 + $0x80] sm:$0xff] %v591_v59  ;;  %v608_v29 = vmul.f32 %v1784_v22, %v1830_v48  ;;  %v609_v30 = vmul.f32 %v1784_v22, %v1833_v49  ;;  %v610_v31 = vmul.f32 %v1784_v22, %v1836_v50  ;;  %v1982_v41 = vld [vmem:[%s1758_s27 + $0x1e8] sm:$0xff]  ;;  %v1985_v42 = vld [vmem:[%s1758_s27 + $0x1f0] sm:$0xff] }
  0x81   : > { %976 = vst [vmem:[%s1820_s29 + $0x88] sm:$0xff] %v592_v60  ;;  %977 = vst [vmem:[%s1820_s29 + $0x90] sm:$0xff] %v593_v61  ;;  %v611_v36 = vmul.f32 %v1784_v22, %v1847_v55  ;;  %v612_v37 = vmul.f32 %v1784_v22, %v1850_v56  ;;  %v613_v38 = vmul.f32 %v1784_v22, %v1853_v57  ;;  %v1988_v43 = vld [vmem:[%s1758_s27 + $0x1f8] sm:$0xff]  ;;  %v2003_v48 = vld [vmem:[%s1758_s27 + $0x200] sm:$0xff] }
  0x82   : > { %978 = vst [vmem:[%s1820_s29 + $0x98] sm:$0xff] %v594_v62  ;;  %979 = vst [vmem:[%s1820_s29 + $0xa0] sm:$0xff] %v595_v3  ;;  %v614_v39 = vmul.f32 %v1784_v22, %v1856_v58  ;;  %v615_v44 = vmul.f32 %v1784_v22, %v1867_v63  ;;  %v616_v45 = vmul.f32 %v1784_v22, %v1870_v0  ;;  %v2006_v49 = vld [vmem:[%s1758_s27 + $0x208] sm:$0xff]  ;;  %v2009_v50 = vld [vmem:[%s1758_s27 + $0x210] sm:$0xff] }
  0x83   : > { %980 = vst [vmem:[%s1820_s29 + $0xa8] sm:$0xff] %v596_v4  ;;  %981 = vst [vmem:[%s1820_s29 + $0xb0] sm:$0xff] %v597_v5  ;;  %v617_v46 = vmul.f32 %v1784_v22, %v1873_v1  ;;  %v618_v47 = vmul.f32 %v1784_v22, %v1876_v2  ;;  %v2012_v51 = vld [vmem:[%s1758_s27 + $0x218] sm:$0xff]  ;;  %v619_v52 = vmul.f32 %v1784_v22, %v1887_v7  ;;  %v2027_v56 = vld [vmem:[%s1758_s27 + $0x220] sm:$0xff] }
  0x84   : > { %982 = vst [vmem:[%s1820_s29 + $0xb8] sm:$0xff] %v598_v6  ;;  %983 = vst [vmem:[%s1820_s29 + $0xc0] sm:$0xff] %v599_v11  ;;  %v620_v53 = vmul.f32 %v1784_v22, %v1890_v8  ;;  %v621_v54 = vmul.f32 %v1784_v22, %v1893_v9  ;;  %v622_v55 = vmul.f32 %v1784_v22, %v1896_v10  ;;  %v2030_v57 = vld [vmem:[%s1758_s27 + $0x228] sm:$0xff]  ;;  %v2033_v58 = vld [vmem:[%s1758_s27 + $0x230] sm:$0xff] }
  0x85   : > { %984 = vst [vmem:[%s1820_s29 + $0xc8] sm:$0xff] %v600_v12  ;;  %985 = vst [vmem:[%s1820_s29 + $0xd0] sm:$0xff] %v601_v13  ;;  %v2036_v59 = vld [vmem:[%s1758_s27 + $0x238] sm:$0xff]  ;;  %v623_v60 = vmul.f32 %v1784_v22, %v1907_v15  ;;  %v624_v61 = vmul.f32 %v1784_v22, %v1910_v16  ;;  %v625_v62 = vmul.f32 %v1784_v22, %v1913_v17  ;;  %v2051_v0 = vld [vmem:[%s1758_s27 + $0x240] sm:$0xff] }
  0x86   : > { %986 = vst [vmem:[%s1820_s29 + $0xd8] sm:$0xff] %v602_v14  ;;  %987 = vst [vmem:[%s1820_s29 + $0xe0] sm:$0xff] %v603_v19  ;;  %v626_v63 = vmul.f32 %v1784_v22, %v1916_v18  ;;  %v2054_v1 = vld [vmem:[%s1758_s27 + $0x248] sm:$0xff]  ;;  %v2057_v2 = vld [vmem:[%s1758_s27 + $0x250] sm:$0xff]  ;;  %v627_v4 = vmul.f32 %v1784_v22, %v1931_v24  ;;  %v628_v5 = vmul.f32 %v1784_v22, %v1934_v25 }
  0x87   : > { %988 = vst [vmem:[%s1820_s29 + $0xe8] sm:$0xff] %v604_v20  ;;  %989 = vst [vmem:[%s1820_s29 + $0xf0] sm:$0xff] %v605_v21  ;;  %v2060_v3 = vld [vmem:[%s1758_s27 + $0x258] sm:$0xff]  ;;  %v629_v6 = vmul.f32 %v1784_v22, %v1937_v26  ;;  %v630_v7 = vmul.f32 %v1784_v22, %v1940_v27  ;;  %v2075_v8 = vld [vmem:[%s1758_s27 + $0x260] sm:$0xff]  ;;  %v631_v12 = vmul.f32 %v1784_v22, %v1955_v32 }
  0x88   : > { %990 = vst [vmem:[%s1820_s29 + $0xf8] sm:$0xff] %v606_v23  ;;  %991 = vst [vmem:[%s1820_s29 + $0x100] sm:$0xff] %v607_v28  ;;  %v2078_v9 = vld [vmem:[%s1758_s27 + $0x268] sm:$0xff]  ;;  %v2081_v10 = vld [vmem:[%s1758_s27 + $0x270] sm:$0xff]  ;;  %v632_v13 = vmul.f32 %v1784_v22, %v1958_v33  ;;  %v633_v14 = vmul.f32 %v1784_v22, %v1961_v34  ;;  %v634_v15 = vmul.f32 %v1784_v22, %v1964_v35 }
  0x89   : > { %992 = vst [vmem:[%s1820_s29 + $0x108] sm:$0xff] %v608_v29  ;;  %993 = vst [vmem:[%s1820_s29 + $0x110] sm:$0xff] %v609_v30  ;;  %v2084_v11 = vld [vmem:[%s1758_s27 + $0x278] sm:$0xff]  ;;  %v2099_v16 = vld [vmem:[%s1758_s27 + $0x280] sm:$0xff]  ;;  %v635_v20 = vmul.f32 %v1784_v22, %v1979_v40  ;;  %v636_v21 = vmul.f32 %v1784_v22, %v1982_v41  ;;  %v637_v23 = vmul.f32 %v1784_v22, %v1985_v42 }
  0x8a   : > { %994 = vst [vmem:[%s1820_s29 + $0x118] sm:$0xff] %v610_v31  ;;  %995 = vst [vmem:[%s1820_s29 + $0x120] sm:$0xff] %v611_v36  ;;  %v2102_v17 = vld [vmem:[%s1758_s27 + $0x288] sm:$0xff]  ;;  %v2105_v18 = vld [vmem:[%s1758_s27 + $0x290] sm:$0xff]  ;;  %v638_v24 = vmul.f32 %v1784_v22, %v1988_v43  ;;  %v639_v29 = vmul.f32 %v1784_v22, %v2003_v48  ;;  %v640_v30 = vmul.f32 %v1784_v22, %v2006_v49 }
  0x8b   : > { %996 = vst [vmem:[%s1820_s29 + $0x128] sm:$0xff] %v612_v37  ;;  %997 = vst [vmem:[%s1820_s29 + $0x130] sm:$0xff] %v613_v38  ;;  %v2108_v19 = vld [vmem:[%s1758_s27 + $0x298] sm:$0xff]  ;;  %v2123_v25 = vld [vmem:[%s1758_s27 + $0x2a0] sm:$0xff]  ;;  %v641_v31 = vmul.f32 %v1784_v22, %v2009_v50  ;;  %v642_v32 = vmul.f32 %v1784_v22, %v2012_v51  ;;  %v643_v37 = vmul.f32 %v1784_v22, %v2027_v56 }
  0x8c   : > { %998 = vst [vmem:[%s1820_s29 + $0x138] sm:$0xff] %v614_v39  ;;  %999 = vst [vmem:[%s1820_s29 + $0x140] sm:$0xff] %v615_v44  ;;  %v2126_v26 = vld [vmem:[%s1758_s27 + $0x2a8] sm:$0xff]  ;;  %v2129_v27 = vld [vmem:[%s1758_s27 + $0x2b0] sm:$0xff]  ;;  %v644_v38 = vmul.f32 %v1784_v22, %v2030_v57  ;;  %v645_v39 = vmul.f32 %v1784_v22, %v2033_v58  ;;  %v646_v40 = vmul.f32 %v1784_v22, %v2036_v59 }
  0x8d   : > { %1000 = vst [vmem:[%s1820_s29 + $0x148] sm:$0xff] %v616_v45  ;;  %1001 = vst [vmem:[%s1820_s29 + $0x150] sm:$0xff] %v617_v46  ;;  %v2132_v28 = vld [vmem:[%s1758_s27 + $0x2b8] sm:$0xff]  ;;  %v2147_v33 = vld [vmem:[%s1758_s27 + $0x2c0] sm:$0xff]  ;;  %v647_v45 = vmul.f32 %v1784_v22, %v2051_v0  ;;  %v648_v46 = vmul.f32 %v1784_v22, %v2054_v1  ;;  %v650_v48 = vmul.f32 %v1784_v22, %v2060_v3 }
  0x8e   : > { %1002 = vst [vmem:[%s1820_s29 + $0x158] sm:$0xff] %v618_v47  ;;  %1003 = vst [vmem:[%s1820_s29 + $0x160] sm:$0xff] %v619_v52  ;;  %v2150_v34 = vld [vmem:[%s1758_s27 + $0x2c8] sm:$0xff]  ;;  %v2153_v35 = vld [vmem:[%s1758_s27 + $0x2d0] sm:$0xff]  ;;  %v649_v47 = vmul.f32 %v1784_v22, %v2057_v2  ;;  %v654_v56 = vmul.f32 %v1784_v22, %v2084_v11  ;;  %v658_v0 = vmul.f32 %v1784_v22, %v2108_v19 }
  0x8f   : > { %1004 = vst [vmem:[%s1820_s29 + $0x168] sm:$0xff] %v620_v53  ;;  %1005 = vst [vmem:[%s1820_s29 + $0x170] sm:$0xff] %v621_v54  ;;  %v2156_v36 = vld [vmem:[%s1758_s27 + $0x2d8] sm:$0xff]  ;;  %v2171_v41 = vld [vmem:[%s1758_s27 + $0x2e0] sm:$0xff]  ;;  %v651_v53 = vmul.f32 %v1784_v22, %v2075_v8  ;;  %v652_v54 = vmul.f32 %v1784_v22, %v2078_v9  ;;  %v662_v8 = vmul.f32 %v1784_v22, %v2132_v28 }
  0x90   : > { %1006 = vst [vmem:[%s1820_s29 + $0x178] sm:$0xff] %v622_v55  ;;  %1007 = vst [vmem:[%s1820_s29 + $0x180] sm:$0xff] %v623_v60  ;;  %v2174_v42 = vld [vmem:[%s1758_s27 + $0x2e8] sm:$0xff]  ;;  %v2177_v43 = vld [vmem:[%s1758_s27 + $0x2f0] sm:$0xff]  ;;  %v653_v55 = vmul.f32 %v1784_v22, %v2081_v10 }
  0x91   : > { %1008 = vst [vmem:[%s1820_s29 + $0x188] sm:$0xff] %v624_v61  ;;  %1009 = vst [vmem:[%s1820_s29 + $0x190] sm:$0xff] %v625_v62  ;;  %v2180_v44 = vld [vmem:[%s1758_s27 + $0x2f8] sm:$0xff]  ;;  %v2195_v49 = vld [vmem:[%s1758_s27 + $0x300] sm:$0xff]  ;;  %v655_v61 = vmul.f32 %v1784_v22, %v2099_v16  ;;  %v656_v62 = vmul.f32 %v1784_v22, %v2102_v17  ;;  %v666_v16 = vmul.f32 %v1784_v22, %v2156_v36 }
  0x92   : > { %1010 = vst [vmem:[%s1820_s29 + $0x198] sm:$0xff] %v626_v63  ;;  %1011 = vst [vmem:[%s1820_s29 + $0x1a0] sm:$0xff] %v627_v4  ;;  %v2198_v50 = vld [vmem:[%s1758_s27 + $0x308] sm:$0xff]  ;;  %v2201_v51 = vld [vmem:[%s1758_s27 + $0x310] sm:$0xff]  ;;  %v657_v63 = vmul.f32 %v1784_v22, %v2105_v18 }
  0x93   : > { %1012 = vst [vmem:[%s1820_s29 + $0x1a8] sm:$0xff] %v628_v5  ;;  %1013 = vst [vmem:[%s1820_s29 + $0x1b0] sm:$0xff] %v629_v6  ;;  %v2204_v52 = vld [vmem:[%s1758_s27 + $0x318] sm:$0xff]  ;;  %v2219_v57 = vld [vmem:[%s1758_s27 + $0x320] sm:$0xff]  ;;  %v659_v5 = vmul.f32 %v1784_v22, %v2123_v25  ;;  %v660_v6 = vmul.f32 %v1784_v22, %v2126_v26  ;;  %v670_v25 = vmul.f32 %v1784_v22, %v2180_v44 }
  0x94   : > { %1014 = vst [vmem:[%s1820_s29 + $0x1b8] sm:$0xff] %v630_v7  ;;  %1015 = vst [vmem:[%s1820_s29 + $0x1c0] sm:$0xff] %v631_v12  ;;  %v2222_v58 = vld [vmem:[%s1758_s27 + $0x328] sm:$0xff]  ;;  %v2225_v59 = vld [vmem:[%s1758_s27 + $0x330] sm:$0xff]  ;;  %v661_v7 = vmul.f32 %v1784_v22, %v2129_v27 }
  0x95   : > { %1016 = vst [vmem:[%s1820_s29 + $0x1c8] sm:$0xff] %v632_v13  ;;  %1017 = vst [vmem:[%s1820_s29 + $0x1d0] sm:$0xff] %v633_v14  ;;  %v2228_v60 = vld [vmem:[%s1758_s27 + $0x338] sm:$0xff]  ;;  %v2243_v1 = vld [vmem:[%s1758_s27 + $0x340] sm:$0xff]  ;;  %v663_v13 = vmul.f32 %v1784_v22, %v2147_v33  ;;  %v664_v14 = vmul.f32 %v1784_v22, %v2150_v34  ;;  %v674_v33 = vmul.f32 %v1784_v22, %v2204_v52 }
  0x96   : > { %1018 = vst [vmem:[%s1820_s29 + $0x1d8] sm:$0xff] %v634_v15  ;;  %1019 = vst [vmem:[%s1820_s29 + $0x1e0] sm:$0xff] %v635_v20  ;;  %v2246_v2 = vld [vmem:[%s1758_s27 + $0x348] sm:$0xff]  ;;  %v2249_v3 = vld [vmem:[%s1758_s27 + $0x350] sm:$0xff]  ;;  %v665_v15 = vmul.f32 %v1784_v22, %v2153_v35 }
  0x97   : > { %1020 = vst [vmem:[%s1820_s29 + $0x1e8] sm:$0xff] %v636_v21  ;;  %1021 = vst [vmem:[%s1820_s29 + $0x1f0] sm:$0xff] %v637_v23  ;;  %v2252_v4 = vld [vmem:[%s1758_s27 + $0x358] sm:$0xff]  ;;  %v2267_v9 = vld [vmem:[%s1758_s27 + $0x360] sm:$0xff]  ;;  %v667_v21 = vmul.f32 %v1784_v22, %v2171_v41  ;;  %v668_v23 = vmul.f32 %v1784_v22, %v2174_v42  ;;  %v678_v41 = vmul.f32 %v1784_v22, %v2228_v60 }
  0x98   : > { %1022 = vst [vmem:[%s1820_s29 + $0x1f8] sm:$0xff] %v638_v24  ;;  %1023 = vst [vmem:[%s1820_s29 + $0x200] sm:$0xff] %v639_v29  ;;  %v2270_v10 = vld [vmem:[%s1758_s27 + $0x368] sm:$0xff]  ;;  %v2273_v11 = vld [vmem:[%s1758_s27 + $0x370] sm:$0xff]  ;;  %v669_v24 = vmul.f32 %v1784_v22, %v2177_v43 }
  0x99   : > { %1024 = vst [vmem:[%s1820_s29 + $0x208] sm:$0xff] %v640_v30  ;;  %1025 = vst [vmem:[%s1820_s29 + $0x210] sm:$0xff] %v641_v31  ;;  %v2276_v12 = vld [vmem:[%s1758_s27 + $0x378] sm:$0xff]  ;;  %v2291_v17 = vld [vmem:[%s1758_s27 + $0x380] sm:$0xff]  ;;  %v671_v30 = vmul.f32 %v1784_v22, %v2195_v49  ;;  %v672_v31 = vmul.f32 %v1784_v22, %v2198_v50  ;;  %v682_v49 = vmul.f32 %v1784_v22, %v2252_v4 }
  0x9a   : > { %1026 = vst [vmem:[%s1820_s29 + $0x218] sm:$0xff] %v642_v32  ;;  %1027 = vst [vmem:[%s1820_s29 + $0x220] sm:$0xff] %v643_v37  ;;  %v2294_v18 = vld [vmem:[%s1758_s27 + $0x388] sm:$0xff]  ;;  %v2297_v19 = vld [vmem:[%s1758_s27 + $0x390] sm:$0xff]  ;;  %v673_v32 = vmul.f32 %v1784_v22, %v2201_v51 }
  0x9b   : > { %1028 = vst [vmem:[%s1820_s29 + $0x228] sm:$0xff] %v644_v38  ;;  %1029 = vst [vmem:[%s1820_s29 + $0x230] sm:$0xff] %v645_v39  ;;  %v2300_v20 = vld [vmem:[%s1758_s27 + $0x398] sm:$0xff]  ;;  %v2315_v26 = vld [vmem:[%s1758_s27 + $0x3a0] sm:$0xff]  ;;  %v675_v38 = vmul.f32 %v1784_v22, %v2219_v57  ;;  %v676_v39 = vmul.f32 %v1784_v22, %v2222_v58  ;;  %v686_v57 = vmul.f32 %v1784_v22, %v2276_v12 }
  0x9c   : > { %1030 = vst [vmem:[%s1820_s29 + $0x238] sm:$0xff] %v646_v40  ;;  %1031 = vst [vmem:[%s1820_s29 + $0x240] sm:$0xff] %v647_v45  ;;  %v2318_v27 = vld [vmem:[%s1758_s27 + $0x3a8] sm:$0xff]  ;;  %v2321_v28 = vld [vmem:[%s1758_s27 + $0x3b0] sm:$0xff]  ;;  %v677_v40 = vmul.f32 %v1784_v22, %v2225_v59 }
  0x9d   : > { %1032 = vst [vmem:[%s1820_s29 + $0x248] sm:$0xff] %v648_v46  ;;  %1033 = vst [vmem:[%s1820_s29 + $0x250] sm:$0xff] %v649_v47  ;;  %v2324_v29 = vld [vmem:[%s1758_s27 + $0x3b8] sm:$0xff]  ;;  %v2339_v34 = vld [vmem:[%s1758_s27 + $0x3c0] sm:$0xff]  ;;  %v679_v46 = vmul.f32 %v1784_v22, %v2243_v1  ;;  %v680_v47 = vmul.f32 %v1784_v22, %v2246_v2  ;;  %v690_v1 = vmul.f32 %v1784_v22, %v2300_v20 }
  0x9e   : > { %1034 = vst [vmem:[%s1820_s29 + $0x258] sm:$0xff] %v650_v48  ;;  %1035 = vst [vmem:[%s1820_s29 + $0x260] sm:$0xff] %v651_v53  ;;  %v2342_v35 = vld [vmem:[%s1758_s27 + $0x3c8] sm:$0xff]  ;;  %v2345_v36 = vld [vmem:[%s1758_s27 + $0x3d0] sm:$0xff]  ;;  %v681_v48 = vmul.f32 %v1784_v22, %v2249_v3 }
  0x9f   : > { %1036 = vst [vmem:[%s1820_s29 + $0x268] sm:$0xff] %v652_v54  ;;  %1037 = vst [vmem:[%s1820_s29 + $0x270] sm:$0xff] %v653_v55  ;;  %v2348_v37 = vld [vmem:[%s1758_s27 + $0x3d8] sm:$0xff]  ;;  %v2363_v42 = vld [vmem:[%s1758_s27 + $0x3e0] sm:$0xff]  ;;  %v683_v54 = vmul.f32 %v1784_v22, %v2267_v9  ;;  %v684_v55 = vmul.f32 %v1784_v22, %v2270_v10  ;;  %v694_v9 = vmul.f32 %v1784_v22, %v2324_v29 }
  0xa0   : > { %1038 = vst [vmem:[%s1820_s29 + $0x278] sm:$0xff] %v654_v56  ;;  %1039 = vst [vmem:[%s1820_s29 + $0x280] sm:$0xff] %v655_v61  ;;  %v2366_v43 = vld [vmem:[%s1758_s27 + $0x3e8] sm:$0xff]  ;;  %v2369_v44 = vld [vmem:[%s1758_s27 + $0x3f0] sm:$0xff]  ;;  %v685_v56 = vmul.f32 %v1784_v22, %v2273_v11 }
  0xa1   : > { %1040 = vst [vmem:[%s1820_s29 + $0x288] sm:$0xff] %v656_v62  ;;  %1041 = vst [vmem:[%s1820_s29 + $0x290] sm:$0xff] %v657_v63  ;;  %v2372_v45 = vld [vmem:[%s1758_s27 + $0x3f8] sm:$0xff]  ;;  %v2387_v50 = vld [vmem:[%s1758_s27 + $0x400] sm:$0xff]  ;;  %v687_v62 = vmul.f32 %v1784_v22, %v2291_v17  ;;  %v688_v63 = vmul.f32 %v1784_v22, %v2294_v18  ;;  %v698_v17 = vmul.f32 %v1784_v22, %v2348_v37 }
  0xa2   : > { %1042 = vst [vmem:[%s1820_s29 + $0x298] sm:$0xff] %v658_v0  ;;  %1043 = vst [vmem:[%s1820_s29 + $0x2a0] sm:$0xff] %v659_v5  ;;  %v2390_v51 = vld [vmem:[%s1758_s27 + $0x408] sm:$0xff]  ;;  %v2393_v52 = vld [vmem:[%s1758_s27 + $0x410] sm:$0xff]  ;;  %v689_v0 = vmul.f32 %v1784_v22, %v2297_v19 }
  0xa3   : > { %1044 = vst [vmem:[%s1820_s29 + $0x2a8] sm:$0xff] %v660_v6  ;;  %1045 = vst [vmem:[%s1820_s29 + $0x2b0] sm:$0xff] %v661_v7  ;;  %v2396_v53 = vld [vmem:[%s1758_s27 + $0x418] sm:$0xff]  ;;  %v2411_v58 = vld [vmem:[%s1758_s27 + $0x420] sm:$0xff]  ;;  %v691_v6 = vmul.f32 %v1784_v22, %v2315_v26  ;;  %v692_v7 = vmul.f32 %v1784_v22, %v2318_v27  ;;  %v702_v26 = vmul.f32 %v1784_v22, %v2372_v45 }
  0xa4   : > { %1046 = vst [vmem:[%s1820_s29 + $0x2b8] sm:$0xff] %v662_v8  ;;  %1047 = vst [vmem:[%s1820_s29 + $0x2c0] sm:$0xff] %v663_v13  ;;  %v2414_v59 = vld [vmem:[%s1758_s27 + $0x428] sm:$0xff]  ;;  %v2417_v60 = vld [vmem:[%s1758_s27 + $0x430] sm:$0xff]  ;;  %v693_v8 = vmul.f32 %v1784_v22, %v2321_v28 }
  0xa5   : > { %1048 = vst [vmem:[%s1820_s29 + $0x2c8] sm:$0xff] %v664_v14  ;;  %1049 = vst [vmem:[%s1820_s29 + $0x2d0] sm:$0xff] %v665_v15  ;;  %v2420_v61 = vld [vmem:[%s1758_s27 + $0x438] sm:$0xff]  ;;  %v2435_v2 = vld [vmem:[%s1758_s27 + $0x440] sm:$0xff]  ;;  %v695_v14 = vmul.f32 %v1784_v22, %v2339_v34  ;;  %v696_v15 = vmul.f32 %v1784_v22, %v2342_v35  ;;  %v706_v34 = vmul.f32 %v1784_v22, %v2396_v53 }
  0xa6   : > { %1050 = vst [vmem:[%s1820_s29 + $0x2d8] sm:$0xff] %v666_v16  ;;  %1051 = vst [vmem:[%s1820_s29 + $0x2e0] sm:$0xff] %v667_v21  ;;  %v2438_v3 = vld [vmem:[%s1758_s27 + $0x448] sm:$0xff]  ;;  %v2441_v4 = vld [vmem:[%s1758_s27 + $0x450] sm:$0xff]  ;;  %v697_v16 = vmul.f32 %v1784_v22, %v2345_v36 }
  0xa7   : > { %1052 = vst [vmem:[%s1820_s29 + $0x2e8] sm:$0xff] %v668_v23  ;;  %1053 = vst [vmem:[%s1820_s29 + $0x2f0] sm:$0xff] %v669_v24  ;;  %v2444_v5 = vld [vmem:[%s1758_s27 + $0x458] sm:$0xff]  ;;  %v2459_v10 = vld [vmem:[%s1758_s27 + $0x460] sm:$0xff]  ;;  %v699_v23 = vmul.f32 %v1784_v22, %v2363_v42  ;;  %v700_v24 = vmul.f32 %v1784_v22, %v2366_v43  ;;  %v710_v42 = vmul.f32 %v1784_v22, %v2420_v61 }
  0xa8   : > { %1054 = vst [vmem:[%s1820_s29 + $0x2f8] sm:$0xff] %v670_v25  ;;  %1055 = vst [vmem:[%s1820_s29 + $0x300] sm:$0xff] %v671_v30  ;;  %v2462_v11 = vld [vmem:[%s1758_s27 + $0x468] sm:$0xff]  ;;  %v2465_v12 = vld [vmem:[%s1758_s27 + $0x470] sm:$0xff]  ;;  %v701_v25 = vmul.f32 %v1784_v22, %v2369_v44 }
  0xa9   : > { %1056 = vst [vmem:[%s1820_s29 + $0x308] sm:$0xff] %v672_v31  ;;  %1057 = vst [vmem:[%s1820_s29 + $0x310] sm:$0xff] %v673_v32  ;;  %v2468_v13 = vld [vmem:[%s1758_s27 + $0x478] sm:$0xff]  ;;  %v2483_v18 = vld [vmem:[%s1758_s27 + $0x480] sm:$0xff]  ;;  %v703_v31 = vmul.f32 %v1784_v22, %v2387_v50  ;;  %v704_v32 = vmul.f32 %v1784_v22, %v2390_v51  ;;  %v714_v50 = vmul.f32 %v1784_v22, %v2444_v5 }
  0xaa   : > { %1058 = vst [vmem:[%s1820_s29 + $0x318] sm:$0xff] %v674_v33  ;;  %1059 = vst [vmem:[%s1820_s29 + $0x320] sm:$0xff] %v675_v38  ;;  %v2486_v19 = vld [vmem:[%s1758_s27 + $0x488] sm:$0xff]  ;;  %v2489_v20 = vld [vmem:[%s1758_s27 + $0x490] sm:$0xff]  ;;  %v705_v33 = vmul.f32 %v1784_v22, %v2393_v52 }
  0xab   : > { %1060 = vst [vmem:[%s1820_s29 + $0x328] sm:$0xff] %v676_v39  ;;  %1061 = vst [vmem:[%s1820_s29 + $0x330] sm:$0xff] %v677_v40  ;;  %v2492_v21 = vld [vmem:[%s1758_s27 + $0x498] sm:$0xff]  ;;  %v2507_v27 = vld [vmem:[%s1758_s27 + $0x4a0] sm:$0xff]  ;;  %v707_v39 = vmul.f32 %v1784_v22, %v2411_v58  ;;  %v708_v40 = vmul.f32 %v1784_v22, %v2414_v59  ;;  %v718_v58 = vmul.f32 %v1784_v22, %v2468_v13 }
  0xac   : > { %1062 = vst [vmem:[%s1820_s29 + $0x338] sm:$0xff] %v678_v41  ;;  %1063 = vst [vmem:[%s1820_s29 + $0x340] sm:$0xff] %v679_v46  ;;  %v2510_v28 = vld [vmem:[%s1758_s27 + $0x4a8] sm:$0xff]  ;;  %v2513_v29 = vld [vmem:[%s1758_s27 + $0x4b0] sm:$0xff]  ;;  %v709_v41 = vmul.f32 %v1784_v22, %v2417_v60 }
  0xad   : > { %1064 = vst [vmem:[%s1820_s29 + $0x348] sm:$0xff] %v680_v47  ;;  %1065 = vst [vmem:[%s1820_s29 + $0x350] sm:$0xff] %v681_v48  ;;  %v2516_v30 = vld [vmem:[%s1758_s27 + $0x4b8] sm:$0xff]  ;;  %v2531_v35 = vld [vmem:[%s1758_s27 + $0x4c0] sm:$0xff]  ;;  %v711_v47 = vmul.f32 %v1784_v22, %v2435_v2  ;;  %v712_v48 = vmul.f32 %v1784_v22, %v2438_v3  ;;  %v722_v2 = vmul.f32 %v1784_v22, %v2492_v21 }
  0xae   : > { %1066 = vst [vmem:[%s1820_s29 + $0x358] sm:$0xff] %v682_v49  ;;  %1067 = vst [vmem:[%s1820_s29 + $0x360] sm:$0xff] %v683_v54  ;;  %v2534_v36 = vld [vmem:[%s1758_s27 + $0x4c8] sm:$0xff]  ;;  %v2537_v37 = vld [vmem:[%s1758_s27 + $0x4d0] sm:$0xff]  ;;  %v713_v49 = vmul.f32 %v1784_v22, %v2441_v4 }
  0xaf   : > { %1068 = vst [vmem:[%s1820_s29 + $0x368] sm:$0xff] %v684_v55  ;;  %1069 = vst [vmem:[%s1820_s29 + $0x370] sm:$0xff] %v685_v56  ;;  %v2540_v38 = vld [vmem:[%s1758_s27 + $0x4d8] sm:$0xff]  ;;  %v2555_v43 = vld [vmem:[%s1758_s27 + $0x4e0] sm:$0xff]  ;;  %v715_v55 = vmul.f32 %v1784_v22, %v2459_v10  ;;  %v716_v56 = vmul.f32 %v1784_v22, %v2462_v11  ;;  %v726_v10 = vmul.f32 %v1784_v22, %v2516_v30 }
  0xb0   : > { %1070 = vst [vmem:[%s1820_s29 + $0x378] sm:$0xff] %v686_v57  ;;  %1071 = vst [vmem:[%s1820_s29 + $0x380] sm:$0xff] %v687_v62  ;;  %v2558_v44 = vld [vmem:[%s1758_s27 + $0x4e8] sm:$0xff]  ;;  %v2561_v45 = vld [vmem:[%s1758_s27 + $0x4f0] sm:$0xff]  ;;  %v717_v57 = vmul.f32 %v1784_v22, %v2465_v12 }
  0xb1   : > { %1072 = vst [vmem:[%s1820_s29 + $0x388] sm:$0xff] %v688_v63  ;;  %1073 = vst [vmem:[%s1820_s29 + $0x390] sm:$0xff] %v689_v0  ;;  %v2564_v46 = vld [vmem:[%s1758_s27 + $0x4f8] sm:$0xff]  ;;  %v2579_v51 = vld [vmem:[%s1758_s27 + $0x500] sm:$0xff]  ;;  %v719_v63 = vmul.f32 %v1784_v22, %v2483_v18  ;;  %v720_v0 = vmul.f32 %v1784_v22, %v2486_v19  ;;  %v730_v18 = vmul.f32 %v1784_v22, %v2540_v38 }
  0xb2   : > { %1074 = vst [vmem:[%s1820_s29 + $0x398] sm:$0xff] %v690_v1  ;;  %1075 = vst [vmem:[%s1820_s29 + $0x3a0] sm:$0xff] %v691_v6  ;;  %v2582_v52 = vld [vmem:[%s1758_s27 + $0x508] sm:$0xff]  ;;  %v2585_v53 = vld [vmem:[%s1758_s27 + $0x510] sm:$0xff]  ;;  %v721_v1 = vmul.f32 %v1784_v22, %v2489_v20 }
  0xb3   : > { %1076 = vst [vmem:[%s1820_s29 + $0x3a8] sm:$0xff] %v692_v7  ;;  %1077 = vst [vmem:[%s1820_s29 + $0x3b0] sm:$0xff] %v693_v8  ;;  %v2588_v54 = vld [vmem:[%s1758_s27 + $0x518] sm:$0xff]  ;;  %v2603_v59 = vld [vmem:[%s1758_s27 + $0x520] sm:$0xff]  ;;  %v723_v7 = vmul.f32 %v1784_v22, %v2507_v27  ;;  %v724_v8 = vmul.f32 %v1784_v22, %v2510_v28  ;;  %v734_v27 = vmul.f32 %v1784_v22, %v2564_v46 }
  0xb4   : > { %1078 = vst [vmem:[%s1820_s29 + $0x3b8] sm:$0xff] %v694_v9  ;;  %1079 = vst [vmem:[%s1820_s29 + $0x3c0] sm:$0xff] %v695_v14  ;;  %v2606_v60 = vld [vmem:[%s1758_s27 + $0x528] sm:$0xff]  ;;  %v2609_v61 = vld [vmem:[%s1758_s27 + $0x530] sm:$0xff]  ;;  %v725_v9 = vmul.f32 %v1784_v22, %v2513_v29 }
  0xb5   : > { %1080 = vst [vmem:[%s1820_s29 + $0x3c8] sm:$0xff] %v696_v15  ;;  %1081 = vst [vmem:[%s1820_s29 + $0x3d0] sm:$0xff] %v697_v16  ;;  %v2612_v62 = vld [vmem:[%s1758_s27 + $0x538] sm:$0xff]  ;;  %v2627_v3 = vld [vmem:[%s1758_s27 + $0x540] sm:$0xff]  ;;  %v727_v15 = vmul.f32 %v1784_v22, %v2531_v35  ;;  %v728_v16 = vmul.f32 %v1784_v22, %v2534_v36  ;;  %v738_v35 = vmul.f32 %v1784_v22, %v2588_v54 }
  0xb6   : > { %1082 = vst [vmem:[%s1820_s29 + $0x3d8] sm:$0xff] %v698_v17  ;;  %1083 = vst [vmem:[%s1820_s29 + $0x3e0] sm:$0xff] %v699_v23  ;;  %v2630_v4 = vld [vmem:[%s1758_s27 + $0x548] sm:$0xff]  ;;  %v2633_v5 = vld [vmem:[%s1758_s27 + $0x550] sm:$0xff]  ;;  %v729_v17 = vmul.f32 %v1784_v22, %v2537_v37 }
  0xb7   : > { %1084 = vst [vmem:[%s1820_s29 + $0x3e8] sm:$0xff] %v700_v24  ;;  %1085 = vst [vmem:[%s1820_s29 + $0x3f0] sm:$0xff] %v701_v25  ;;  %v2636_v6 = vld [vmem:[%s1758_s27 + $0x558] sm:$0xff]  ;;  %v2651_v11 = vld [vmem:[%s1758_s27 + $0x560] sm:$0xff]  ;;  %v731_v24 = vmul.f32 %v1784_v22, %v2555_v43  ;;  %v732_v25 = vmul.f32 %v1784_v22, %v2558_v44  ;;  %v742_v43 = vmul.f32 %v1784_v22, %v2612_v62 }
  0xb8   : > { %1086 = vst [vmem:[%s1820_s29 + $0x3f8] sm:$0xff] %v702_v26  ;;  %1087 = vst [vmem:[%s1820_s29 + $0x400] sm:$0xff] %v703_v31  ;;  %v2654_v12 = vld [vmem:[%s1758_s27 + $0x568] sm:$0xff]  ;;  %v2657_v13 = vld [vmem:[%s1758_s27 + $0x570] sm:$0xff]  ;;  %v733_v26 = vmul.f32 %v1784_v22, %v2561_v45 }
  0xb9   : > { %1088 = vst [vmem:[%s1820_s29 + $0x408] sm:$0xff] %v704_v32  ;;  %1089 = vst [vmem:[%s1820_s29 + $0x410] sm:$0xff] %v705_v33  ;;  %v2660_v14 = vld [vmem:[%s1758_s27 + $0x578] sm:$0xff]  ;;  %v2675_v19 = vld [vmem:[%s1758_s27 + $0x580] sm:$0xff]  ;;  %v735_v32 = vmul.f32 %v1784_v22, %v2579_v51  ;;  %v736_v33 = vmul.f32 %v1784_v22, %v2582_v52  ;;  %v746_v51 = vmul.f32 %v1784_v22, %v2636_v6 }
  0xba   : > { %1090 = vst [vmem:[%s1820_s29 + $0x418] sm:$0xff] %v706_v34  ;;  %1091 = vst [vmem:[%s1820_s29 + $0x420] sm:$0xff] %v707_v39  ;;  %v2678_v20 = vld [vmem:[%s1758_s27 + $0x588] sm:$0xff]  ;;  %v2681_v21 = vld [vmem:[%s1758_s27 + $0x590] sm:$0xff]  ;;  %v737_v34 = vmul.f32 %v1784_v22, %v2585_v53 }
  0xbb   : > { %1092 = vst [vmem:[%s1820_s29 + $0x428] sm:$0xff] %v708_v40  ;;  %1093 = vst [vmem:[%s1820_s29 + $0x430] sm:$0xff] %v709_v41  ;;  %v2684_v23 = vld [vmem:[%s1758_s27 + $0x598] sm:$0xff]  ;;  %v2699_v28 = vld [vmem:[%s1758_s27 + $0x5a0] sm:$0xff]  ;;  %v739_v40 = vmul.f32 %v1784_v22, %v2603_v59  ;;  %v740_v41 = vmul.f32 %v1784_v22, %v2606_v60  ;;  %v750_v59 = vmul.f32 %v1784_v22, %v2660_v14 }
  0xbc   : > { %1094 = vst [vmem:[%s1820_s29 + $0x438] sm:$0xff] %v710_v42  ;;  %1095 = vst [vmem:[%s1820_s29 + $0x440] sm:$0xff] %v711_v47  ;;  %v2702_v29 = vld [vmem:[%s1758_s27 + $0x5a8] sm:$0xff]  ;;  %v2705_v30 = vld [vmem:[%s1758_s27 + $0x5b0] sm:$0xff]  ;;  %v741_v42 = vmul.f32 %v1784_v22, %v2609_v61 }
  0xbd   : > { %1096 = vst [vmem:[%s1820_s29 + $0x448] sm:$0xff] %v712_v48  ;;  %1097 = vst [vmem:[%s1820_s29 + $0x450] sm:$0xff] %v713_v49  ;;  %v2708_v31 = vld [vmem:[%s1758_s27 + $0x5b8] sm:$0xff]  ;;  %v2723_v36 = vld [vmem:[%s1758_s27 + $0x5c0] sm:$0xff]  ;;  %v743_v48 = vmul.f32 %v1784_v22, %v2627_v3  ;;  %v744_v49 = vmul.f32 %v1784_v22, %v2630_v4  ;;  %v754_v3 = vmul.f32 %v1784_v22, %v2684_v23 }
  0xbe   : > { %1098 = vst [vmem:[%s1820_s29 + $0x458] sm:$0xff] %v714_v50  ;;  %1099 = vst [vmem:[%s1820_s29 + $0x460] sm:$0xff] %v715_v55  ;;  %v2726_v37 = vld [vmem:[%s1758_s27 + $0x5c8] sm:$0xff]  ;;  %v2729_v38 = vld [vmem:[%s1758_s27 + $0x5d0] sm:$0xff]  ;;  %v745_v50 = vmul.f32 %v1784_v22, %v2633_v5 }
  0xbf   : > { %1100 = vst [vmem:[%s1820_s29 + $0x468] sm:$0xff] %v716_v56  ;;  %1101 = vst [vmem:[%s1820_s29 + $0x470] sm:$0xff] %v717_v57  ;;  %v2732_v39 = vld [vmem:[%s1758_s27 + $0x5d8] sm:$0xff]  ;;  %v2747_v44 = vld [vmem:[%s1758_s27 + $0x5e0] sm:$0xff]  ;;  %v747_v56 = vmul.f32 %v1784_v22, %v2651_v11  ;;  %v748_v57 = vmul.f32 %v1784_v22, %v2654_v12  ;;  %v758_v11 = vmul.f32 %v1784_v22, %v2708_v31 }
  0xc0   : > { %1102 = vst [vmem:[%s1820_s29 + $0x478] sm:$0xff] %v718_v58  ;;  %1103 = vst [vmem:[%s1820_s29 + $0x480] sm:$0xff] %v719_v63  ;;  %v2750_v45 = vld [vmem:[%s1758_s27 + $0x5e8] sm:$0xff]  ;;  %v2753_v46 = vld [vmem:[%s1758_s27 + $0x5f0] sm:$0xff]  ;;  %v749_v58 = vmul.f32 %v1784_v22, %v2657_v13 }
  0xc1   : > { %1104 = vst [vmem:[%s1820_s29 + $0x488] sm:$0xff] %v720_v0  ;;  %1105 = vst [vmem:[%s1820_s29 + $0x490] sm:$0xff] %v721_v1  ;;  %v2756_v47 = vld [vmem:[%s1758_s27 + $0x5f8] sm:$0xff]  ;;  %v2771_v52 = vld [vmem:[%s1758_s27 + $0x600] sm:$0xff]  ;;  %v751_v0 = vmul.f32 %v1784_v22, %v2675_v19  ;;  %v752_v1 = vmul.f32 %v1784_v22, %v2678_v20  ;;  %v762_v19 = vmul.f32 %v1784_v22, %v2732_v39 }
  0xc2   : > { %1106 = vst [vmem:[%s1820_s29 + $0x498] sm:$0xff] %v722_v2  ;;  %1107 = vst [vmem:[%s1820_s29 + $0x4a0] sm:$0xff] %v723_v7  ;;  %v2774_v53 = vld [vmem:[%s1758_s27 + $0x608] sm:$0xff]  ;;  %v2777_v54 = vld [vmem:[%s1758_s27 + $0x610] sm:$0xff]  ;;  %v753_v2 = vmul.f32 %v1784_v22, %v2681_v21 }
  0xc3   : > { %1108 = vst [vmem:[%s1820_s29 + $0x4a8] sm:$0xff] %v724_v8  ;;  %1109 = vst [vmem:[%s1820_s29 + $0x4b0] sm:$0xff] %v725_v9  ;;  %v2780_v55 = vld [vmem:[%s1758_s27 + $0x618] sm:$0xff]  ;;  %v2795_v60 = vld [vmem:[%s1758_s27 + $0x620] sm:$0xff]  ;;  %v755_v8 = vmul.f32 %v1784_v22, %v2699_v28  ;;  %v756_v9 = vmul.f32 %v1784_v22, %v2702_v29  ;;  %v766_v28 = vmul.f32 %v1784_v22, %v2756_v47 }
  0xc4   : > { %1110 = vst [vmem:[%s1820_s29 + $0x4b8] sm:$0xff] %v726_v10  ;;  %1111 = vst [vmem:[%s1820_s29 + $0x4c0] sm:$0xff] %v727_v15  ;;  %v2798_v61 = vld [vmem:[%s1758_s27 + $0x628] sm:$0xff]  ;;  %v2801_v62 = vld [vmem:[%s1758_s27 + $0x630] sm:$0xff]  ;;  %v757_v10 = vmul.f32 %v1784_v22, %v2705_v30 }
  0xc5   : > { %1112 = vst [vmem:[%s1820_s29 + $0x4c8] sm:$0xff] %v728_v16  ;;  %1113 = vst [vmem:[%s1820_s29 + $0x4d0] sm:$0xff] %v729_v17  ;;  %v2804_v63 = vld [vmem:[%s1758_s27 + $0x638] sm:$0xff]  ;;  %v2819_v4 = vld [vmem:[%s1758_s27 + $0x640] sm:$0xff]  ;;  %v759_v16 = vmul.f32 %v1784_v22, %v2723_v36  ;;  %v760_v17 = vmul.f32 %v1784_v22, %v2726_v37  ;;  %v770_v36 = vmul.f32 %v1784_v22, %v2780_v55 }
  0xc6   : > { %1114 = vst [vmem:[%s1820_s29 + $0x4d8] sm:$0xff] %v730_v18  ;;  %1115 = vst [vmem:[%s1820_s29 + $0x4e0] sm:$0xff] %v731_v24  ;;  %v2822_v5 = vld [vmem:[%s1758_s27 + $0x648] sm:$0xff]  ;;  %v2825_v6 = vld [vmem:[%s1758_s27 + $0x650] sm:$0xff]  ;;  %v761_v18 = vmul.f32 %v1784_v22, %v2729_v38 }
  0xc7   : > { %1116 = vst [vmem:[%s1820_s29 + $0x4e8] sm:$0xff] %v732_v25  ;;  %1117 = vst [vmem:[%s1820_s29 + $0x4f0] sm:$0xff] %v733_v26  ;;  %v2828_v7 = vld [vmem:[%s1758_s27 + $0x658] sm:$0xff]  ;;  %v2843_v12 = vld [vmem:[%s1758_s27 + $0x660] sm:$0xff]  ;;  %v763_v25 = vmul.f32 %v1784_v22, %v2747_v44  ;;  %v764_v26 = vmul.f32 %v1784_v22, %v2750_v45  ;;  %v774_v44 = vmul.f32 %v1784_v22, %v2804_v63 }
  0xc8   : > { %1118 = vst [vmem:[%s1820_s29 + $0x4f8] sm:$0xff] %v734_v27  ;;  %1119 = vst [vmem:[%s1820_s29 + $0x500] sm:$0xff] %v735_v32  ;;  %v2846_v13 = vld [vmem:[%s1758_s27 + $0x668] sm:$0xff]  ;;  %v2849_v14 = vld [vmem:[%s1758_s27 + $0x670] sm:$0xff]  ;;  %v765_v27 = vmul.f32 %v1784_v22, %v2753_v46 }
  0xc9   : > { %1120 = vst [vmem:[%s1820_s29 + $0x508] sm:$0xff] %v736_v33  ;;  %1121 = vst [vmem:[%s1820_s29 + $0x510] sm:$0xff] %v737_v34  ;;  %v2852_v15 = vld [vmem:[%s1758_s27 + $0x678] sm:$0xff]  ;;  %v2867_v20 = vld [vmem:[%s1758_s27 + $0x680] sm:$0xff]  ;;  %v767_v33 = vmul.f32 %v1784_v22, %v2771_v52  ;;  %v768_v34 = vmul.f32 %v1784_v22, %v2774_v53  ;;  %v778_v52 = vmul.f32 %v1784_v22, %v2828_v7 }
  0xca   : > { %1122 = vst [vmem:[%s1820_s29 + $0x518] sm:$0xff] %v738_v35  ;;  %1123 = vst [vmem:[%s1820_s29 + $0x520] sm:$0xff] %v739_v40  ;;  %v2870_v21 = vld [vmem:[%s1758_s27 + $0x688] sm:$0xff]  ;;  %v2873_v23 = vld [vmem:[%s1758_s27 + $0x690] sm:$0xff]  ;;  %v769_v35 = vmul.f32 %v1784_v22, %v2777_v54 }
  0xcb   : > { %1124 = vst [vmem:[%s1820_s29 + $0x528] sm:$0xff] %v740_v41  ;;  %1125 = vst [vmem:[%s1820_s29 + $0x530] sm:$0xff] %v741_v42  ;;  %v2876_v24 = vld [vmem:[%s1758_s27 + $0x698] sm:$0xff]  ;;  %v2891_v29 = vld [vmem:[%s1758_s27 + $0x6a0] sm:$0xff]  ;;  %v771_v41 = vmul.f32 %v1784_v22, %v2795_v60  ;;  %v772_v42 = vmul.f32 %v1784_v22, %v2798_v61  ;;  %v782_v60 = vmul.f32 %v1784_v22, %v2852_v15 }
  0xcc   : > { %1126 = vst [vmem:[%s1820_s29 + $0x538] sm:$0xff] %v742_v43  ;;  %1127 = vst [vmem:[%s1820_s29 + $0x540] sm:$0xff] %v743_v48  ;;  %v2894_v30 = vld [vmem:[%s1758_s27 + $0x6a8] sm:$0xff]  ;;  %v2897_v31 = vld [vmem:[%s1758_s27 + $0x6b0] sm:$0xff]  ;;  %v773_v43 = vmul.f32 %v1784_v22, %v2801_v62 }
  0xcd   : > { %1128 = vst [vmem:[%s1820_s29 + $0x548] sm:$0xff] %v744_v49  ;;  %1129 = vst [vmem:[%s1820_s29 + $0x550] sm:$0xff] %v745_v50  ;;  %v2900_v32 = vld [vmem:[%s1758_s27 + $0x6b8] sm:$0xff]  ;;  %v2915_v37 = vld [vmem:[%s1758_s27 + $0x6c0] sm:$0xff]  ;;  %v775_v49 = vmul.f32 %v1784_v22, %v2819_v4  ;;  %v776_v50 = vmul.f32 %v1784_v22, %v2822_v5  ;;  %v786_v4 = vmul.f32 %v1784_v22, %v2876_v24 }
  0xce   : > { %1130 = vst [vmem:[%s1820_s29 + $0x558] sm:$0xff] %v746_v51  ;;  %1131 = vst [vmem:[%s1820_s29 + $0x560] sm:$0xff] %v747_v56  ;;  %v2918_v38 = vld [vmem:[%s1758_s27 + $0x6c8] sm:$0xff]  ;;  %v2921_v39 = vld [vmem:[%s1758_s27 + $0x6d0] sm:$0xff]  ;;  %v777_v51 = vmul.f32 %v1784_v22, %v2825_v6 }
  0xcf   : > { %1132 = vst [vmem:[%s1820_s29 + $0x568] sm:$0xff] %v748_v57  ;;  %1133 = vst [vmem:[%s1820_s29 + $0x570] sm:$0xff] %v749_v58  ;;  %v2924_v40 = vld [vmem:[%s1758_s27 + $0x6d8] sm:$0xff]  ;;  %v2939_v45 = vld [vmem:[%s1758_s27 + $0x6e0] sm:$0xff]  ;;  %v779_v57 = vmul.f32 %v1784_v22, %v2843_v12  ;;  %v780_v58 = vmul.f32 %v1784_v22, %v2846_v13  ;;  %v790_v12 = vmul.f32 %v1784_v22, %v2900_v32 }
  0xd0   : > { %1134 = vst [vmem:[%s1820_s29 + $0x578] sm:$0xff] %v750_v59  ;;  %1135 = vst [vmem:[%s1820_s29 + $0x580] sm:$0xff] %v751_v0  ;;  %v2942_v46 = vld [vmem:[%s1758_s27 + $0x6e8] sm:$0xff]  ;;  %v2945_v47 = vld [vmem:[%s1758_s27 + $0x6f0] sm:$0xff]  ;;  %v781_v59 = vmul.f32 %v1784_v22, %v2849_v14 }
  0xd1   : > { %1136 = vst [vmem:[%s1820_s29 + $0x588] sm:$0xff] %v752_v1  ;;  %1137 = vst [vmem:[%s1820_s29 + $0x590] sm:$0xff] %v753_v2  ;;  %v2948_v48 = vld [vmem:[%s1758_s27 + $0x6f8] sm:$0xff]  ;;  %v2963_v53 = vld [vmem:[%s1758_s27 + $0x700] sm:$0xff]  ;;  %v783_v1 = vmul.f32 %v1784_v22, %v2867_v20  ;;  %v784_v2 = vmul.f32 %v1784_v22, %v2870_v21  ;;  %v794_v20 = vmul.f32 %v1784_v22, %v2924_v40 }
  0xd2   : > { %1138 = vst [vmem:[%s1820_s29 + $0x598] sm:$0xff] %v754_v3  ;;  %1139 = vst [vmem:[%s1820_s29 + $0x5a0] sm:$0xff] %v755_v8  ;;  %v2966_v54 = vld [vmem:[%s1758_s27 + $0x708] sm:$0xff]  ;;  %v2969_v55 = vld [vmem:[%s1758_s27 + $0x710] sm:$0xff]  ;;  %v785_v3 = vmul.f32 %v1784_v22, %v2873_v23 }
  0xd3   : > { %1140 = vst [vmem:[%s1820_s29 + $0x5a8] sm:$0xff] %v756_v9  ;;  %1141 = vst [vmem:[%s1820_s29 + $0x5b0] sm:$0xff] %v757_v10  ;;  %v2972_v56 = vld [vmem:[%s1758_s27 + $0x718] sm:$0xff]  ;;  %v2987_v61 = vld [vmem:[%s1758_s27 + $0x720] sm:$0xff]  ;;  %v787_v9 = vmul.f32 %v1784_v22, %v2891_v29  ;;  %v788_v10 = vmul.f32 %v1784_v22, %v2894_v30  ;;  %v798_v29 = vmul.f32 %v1784_v22, %v2948_v48 }
  0xd4   : > { %1142 = vst [vmem:[%s1820_s29 + $0x5b8] sm:$0xff] %v758_v11  ;;  %1143 = vst [vmem:[%s1820_s29 + $0x5c0] sm:$0xff] %v759_v16  ;;  %v2990_v62 = vld [vmem:[%s1758_s27 + $0x728] sm:$0xff]  ;;  %v2993_v63 = vld [vmem:[%s1758_s27 + $0x730] sm:$0xff]  ;;  %v789_v11 = vmul.f32 %v1784_v22, %v2897_v31 }
  0xd5   : > { %1144 = vst [vmem:[%s1820_s29 + $0x5c8] sm:$0xff] %v760_v17  ;;  %1145 = vst [vmem:[%s1820_s29 + $0x5d0] sm:$0xff] %v761_v18  ;;  %v2996_v0 = vld [vmem:[%s1758_s27 + $0x738] sm:$0xff]  ;;  %v3011_v5 = vld [vmem:[%s1758_s27 + $0x740] sm:$0xff]  ;;  %v791_v17 = vmul.f32 %v1784_v22, %v2915_v37  ;;  %v792_v18 = vmul.f32 %v1784_v22, %v2918_v38  ;;  %v802_v37 = vmul.f32 %v1784_v22, %v2972_v56 }
  0xd6   : > { %1146 = vst [vmem:[%s1820_s29 + $0x5d8] sm:$0xff] %v762_v19  ;;  %1147 = vst [vmem:[%s1820_s29 + $0x5e0] sm:$0xff] %v763_v25  ;;  %v3014_v6 = vld [vmem:[%s1758_s27 + $0x748] sm:$0xff]  ;;  %v3017_v7 = vld [vmem:[%s1758_s27 + $0x750] sm:$0xff]  ;;  %v793_v19 = vmul.f32 %v1784_v22, %v2921_v39 }
  0xd7   : > { %1148 = vst [vmem:[%s1820_s29 + $0x5e8] sm:$0xff] %v764_v26  ;;  %1149 = vst [vmem:[%s1820_s29 + $0x5f0] sm:$0xff] %v765_v27  ;;  %v3020_v8 = vld [vmem:[%s1758_s27 + $0x758] sm:$0xff]  ;;  %v3035_v13 = vld [vmem:[%s1758_s27 + $0x760] sm:$0xff]  ;;  %v795_v26 = vmul.f32 %v1784_v22, %v2939_v45  ;;  %v796_v27 = vmul.f32 %v1784_v22, %v2942_v46  ;;  %v806_v45 = vmul.f32 %v1784_v22, %v2996_v0 }
  0xd8   : > { %1150 = vst [vmem:[%s1820_s29 + $0x5f8] sm:$0xff] %v766_v28  ;;  %1151 = vst [vmem:[%s1820_s29 + $0x600] sm:$0xff] %v767_v33  ;;  %v3038_v14 = vld [vmem:[%s1758_s27 + $0x768] sm:$0xff]  ;;  %v3041_v15 = vld [vmem:[%s1758_s27 + $0x770] sm:$0xff]  ;;  %v797_v28 = vmul.f32 %v1784_v22, %v2945_v47 }
  0xd9   : > { %1152 = vst [vmem:[%s1820_s29 + $0x608] sm:$0xff] %v768_v34  ;;  %1153 = vst [vmem:[%s1820_s29 + $0x610] sm:$0xff] %v769_v35  ;;  %v3044_v16 = vld [vmem:[%s1758_s27 + $0x778] sm:$0xff]  ;;  %v3059_v21 = vld [vmem:[%s1758_s27 + $0x780] sm:$0xff]  ;;  %v799_v34 = vmul.f32 %v1784_v22, %v2963_v53  ;;  %v800_v35 = vmul.f32 %v1784_v22, %v2966_v54  ;;  %v810_v53 = vmul.f32 %v1784_v22, %v3020_v8 }
  0xda   : > { %1154 = vst [vmem:[%s1820_s29 + $0x618] sm:$0xff] %v770_v36  ;;  %1155 = vst [vmem:[%s1820_s29 + $0x620] sm:$0xff] %v771_v41  ;;  %v3062_v23 = vld [vmem:[%s1758_s27 + $0x788] sm:$0xff]  ;;  %v3065_v24 = vld [vmem:[%s1758_s27 + $0x790] sm:$0xff]  ;;  %v801_v36 = vmul.f32 %v1784_v22, %v2969_v55 }
  0xdb   : > { %1156 = vst [vmem:[%s1820_s29 + $0x628] sm:$0xff] %v772_v42  ;;  %1157 = vst [vmem:[%s1820_s29 + $0x630] sm:$0xff] %v773_v43  ;;  %v3068_v25 = vld [vmem:[%s1758_s27 + $0x798] sm:$0xff]  ;;  %v3083_v30 = vld [vmem:[%s1758_s27 + $0x7a0] sm:$0xff]  ;;  %v803_v42 = vmul.f32 %v1784_v22, %v2987_v61  ;;  %v804_v43 = vmul.f32 %v1784_v22, %v2990_v62  ;;  %v814_v61 = vmul.f32 %v1784_v22, %v3044_v16 }
  0xdc   : > { %1158 = vst [vmem:[%s1820_s29 + $0x638] sm:$0xff] %v774_v44  ;;  %1159 = vst [vmem:[%s1820_s29 + $0x640] sm:$0xff] %v775_v49  ;;  %v3086_v31 = vld [vmem:[%s1758_s27 + $0x7a8] sm:$0xff]  ;;  %v3089_v32 = vld [vmem:[%s1758_s27 + $0x7b0] sm:$0xff]  ;;  %v805_v44 = vmul.f32 %v1784_v22, %v2993_v63 }
  0xdd   : > { %1160 = vst [vmem:[%s1820_s29 + $0x648] sm:$0xff] %v776_v50  ;;  %1161 = vst [vmem:[%s1820_s29 + $0x650] sm:$0xff] %v777_v51  ;;  %v3092_v33 = vld [vmem:[%s1758_s27 + $0x7b8] sm:$0xff]  ;;  %v3107_v38 = vld [vmem:[%s1758_s27 + $0x7c0] sm:$0xff]  ;;  %v807_v50 = vmul.f32 %v1784_v22, %v3011_v5  ;;  %v808_v51 = vmul.f32 %v1784_v22, %v3014_v6  ;;  %v818_v5 = vmul.f32 %v1784_v22, %v3068_v25 }
  0xde   : > { %1162 = vst [vmem:[%s1820_s29 + $0x658] sm:$0xff] %v778_v52  ;;  %1163 = vst [vmem:[%s1820_s29 + $0x660] sm:$0xff] %v779_v57  ;;  %v3110_v39 = vld [vmem:[%s1758_s27 + $0x7c8] sm:$0xff]  ;;  %v3113_v40 = vld [vmem:[%s1758_s27 + $0x7d0] sm:$0xff]  ;;  %v809_v52 = vmul.f32 %v1784_v22, %v3017_v7 }
  0xdf   : > { %1164 = vst [vmem:[%s1820_s29 + $0x668] sm:$0xff] %v780_v58  ;;  %1165 = vst [vmem:[%s1820_s29 + $0x670] sm:$0xff] %v781_v59  ;;  %v3116_v41 = vld [vmem:[%s1758_s27 + $0x7d8] sm:$0xff]  ;;  %v3131_v46 = vld [vmem:[%s1758_s27 + $0x7e0] sm:$0xff]  ;;  %v811_v58 = vmul.f32 %v1784_v22, %v3035_v13  ;;  %v812_v59 = vmul.f32 %v1784_v22, %v3038_v14  ;;  %v822_v13 = vmul.f32 %v1784_v22, %v3092_v33 }
  0xe0   : > { %1166 = vst [vmem:[%s1820_s29 + $0x678] sm:$0xff] %v782_v60  ;;  %1167 = vst [vmem:[%s1820_s29 + $0x680] sm:$0xff] %v783_v1  ;;  %v3134_v47 = vld [vmem:[%s1758_s27 + $0x7e8] sm:$0xff]  ;;  %v3137_v48 = vld [vmem:[%s1758_s27 + $0x7f0] sm:$0xff]  ;;  %v813_v60 = vmul.f32 %v1784_v22, %v3041_v15 }
  0xe1   : > { %1168 = vst [vmem:[%s1820_s29 + $0x688] sm:$0xff] %v784_v2  ;;  %1169 = vst [vmem:[%s1820_s29 + $0x690] sm:$0xff] %v785_v3  ;;  %v3140_v49 = vld [vmem:[%s1758_s27 + $0x7f8] sm:$0xff]  ;;  %v3155_v54 = vld [vmem:[%s1758_s27 + $0x800] sm:$0xff]  ;;  %v815_v2 = vmul.f32 %v1784_v22, %v3059_v21  ;;  %v816_v3 = vmul.f32 %v1784_v22, %v3062_v23  ;;  %v826_v21 = vmul.f32 %v1784_v22, %v3116_v41 }
  0xe2   : > { %1170 = vst [vmem:[%s1820_s29 + $0x698] sm:$0xff] %v786_v4  ;;  %1171 = vst [vmem:[%s1820_s29 + $0x6a0] sm:$0xff] %v787_v9  ;;  %v3158_v55 = vld [vmem:[%s1758_s27 + $0x808] sm:$0xff]  ;;  %v3161_v56 = vld [vmem:[%s1758_s27 + $0x810] sm:$0xff]  ;;  %v817_v4 = vmul.f32 %v1784_v22, %v3065_v24 }
  0xe3   : > { %1172 = vst [vmem:[%s1820_s29 + $0x6a8] sm:$0xff] %v788_v10  ;;  %1173 = vst [vmem:[%s1820_s29 + $0x6b0] sm:$0xff] %v789_v11  ;;  %v3164_v57 = vld [vmem:[%s1758_s27 + $0x818] sm:$0xff]  ;;  %v3179_v62 = vld [vmem:[%s1758_s27 + $0x820] sm:$0xff]  ;;  %v819_v10 = vmul.f32 %v1784_v22, %v3083_v30  ;;  %v820_v11 = vmul.f32 %v1784_v22, %v3086_v31  ;;  %v830_v30 = vmul.f32 %v1784_v22, %v3140_v49 }
  0xe4   : > { %1174 = vst [vmem:[%s1820_s29 + $0x6b8] sm:$0xff] %v790_v12  ;;  %1175 = vst [vmem:[%s1820_s29 + $0x6c0] sm:$0xff] %v791_v17  ;;  %v3182_v63 = vld [vmem:[%s1758_s27 + $0x828] sm:$0xff]  ;;  %v3185_v0 = vld [vmem:[%s1758_s27 + $0x830] sm:$0xff]  ;;  %v821_v12 = vmul.f32 %v1784_v22, %v3089_v32 }
  0xe5   : > { %1176 = vst [vmem:[%s1820_s29 + $0x6c8] sm:$0xff] %v792_v18  ;;  %1177 = vst [vmem:[%s1820_s29 + $0x6d0] sm:$0xff] %v793_v19  ;;  %v3188_v1 = vld [vmem:[%s1758_s27 + $0x838] sm:$0xff]  ;;  %v3203_v6 = vld [vmem:[%s1758_s27 + $0x840] sm:$0xff]  ;;  %v823_v18 = vmul.f32 %v1784_v22, %v3107_v38  ;;  %v824_v19 = vmul.f32 %v1784_v22, %v3110_v39  ;;  %v834_v38 = vmul.f32 %v1784_v22, %v3164_v57 }
  0xe6   : > { %1178 = vst [vmem:[%s1820_s29 + $0x6d8] sm:$0xff] %v794_v20  ;;  %1179 = vst [vmem:[%s1820_s29 + $0x6e0] sm:$0xff] %v795_v26  ;;  %v3206_v7 = vld [vmem:[%s1758_s27 + $0x848] sm:$0xff]  ;;  %v3209_v8 = vld [vmem:[%s1758_s27 + $0x850] sm:$0xff]  ;;  %v825_v20 = vmul.f32 %v1784_v22, %v3113_v40 }
  0xe7   : > { %1180 = vst [vmem:[%s1820_s29 + $0x6e8] sm:$0xff] %v796_v27  ;;  %1181 = vst [vmem:[%s1820_s29 + $0x6f0] sm:$0xff] %v797_v28  ;;  %v3212_v9 = vld [vmem:[%s1758_s27 + $0x858] sm:$0xff]  ;;  %v3227_v14 = vld [vmem:[%s1758_s27 + $0x860] sm:$0xff]  ;;  %v827_v27 = vmul.f32 %v1784_v22, %v3131_v46  ;;  %v828_v28 = vmul.f32 %v1784_v22, %v3134_v47  ;;  %v838_v46 = vmul.f32 %v1784_v22, %v3188_v1 }
  0xe8   : > { %1182 = vst [vmem:[%s1820_s29 + $0x6f8] sm:$0xff] %v798_v29  ;;  %1183 = vst [vmem:[%s1820_s29 + $0x700] sm:$0xff] %v799_v34  ;;  %v3230_v15 = vld [vmem:[%s1758_s27 + $0x868] sm:$0xff]  ;;  %v3233_v16 = vld [vmem:[%s1758_s27 + $0x870] sm:$0xff]  ;;  %v829_v29 = vmul.f32 %v1784_v22, %v3137_v48 }
  0xe9   : > { %1184 = vst [vmem:[%s1820_s29 + $0x708] sm:$0xff] %v800_v35  ;;  %1185 = vst [vmem:[%s1820_s29 + $0x710] sm:$0xff] %v801_v36  ;;  %v3236_v17 = vld [vmem:[%s1758_s27 + $0x878] sm:$0xff]  ;;  %v3251_v23 = vld [vmem:[%s1758_s27 + $0x880] sm:$0xff]  ;;  %v831_v35 = vmul.f32 %v1784_v22, %v3155_v54  ;;  %v832_v36 = vmul.f32 %v1784_v22, %v3158_v55  ;;  %v842_v54 = vmul.f32 %v1784_v22, %v3212_v9 }
  0xea   : > { %1186 = vst [vmem:[%s1820_s29 + $0x718] sm:$0xff] %v802_v37  ;;  %1187 = vst [vmem:[%s1820_s29 + $0x720] sm:$0xff] %v803_v42  ;;  %v3254_v24 = vld [vmem:[%s1758_s27 + $0x888] sm:$0xff]  ;;  %v3257_v25 = vld [vmem:[%s1758_s27 + $0x890] sm:$0xff]  ;;  %v833_v37 = vmul.f32 %v1784_v22, %v3161_v56 }
  0xeb   : > { %1188 = vst [vmem:[%s1820_s29 + $0x728] sm:$0xff] %v804_v43  ;;  %1189 = vst [vmem:[%s1820_s29 + $0x730] sm:$0xff] %v805_v44  ;;  %v3260_v26 = vld [vmem:[%s1758_s27 + $0x898] sm:$0xff]  ;;  %v3275_v31 = vld [vmem:[%s1758_s27 + $0x8a0] sm:$0xff]  ;;  %v835_v43 = vmul.f32 %v1784_v22, %v3179_v62  ;;  %v836_v44 = vmul.f32 %v1784_v22, %v3182_v63  ;;  %v846_v62 = vmul.f32 %v1784_v22, %v3236_v17 }
  0xec   : > { %1190 = vst [vmem:[%s1820_s29 + $0x738] sm:$0xff] %v806_v45  ;;  %1191 = vst [vmem:[%s1820_s29 + $0x740] sm:$0xff] %v807_v50  ;;  %v3278_v32 = vld [vmem:[%s1758_s27 + $0x8a8] sm:$0xff]  ;;  %v3281_v33 = vld [vmem:[%s1758_s27 + $0x8b0] sm:$0xff]  ;;  %v837_v45 = vmul.f32 %v1784_v22, %v3185_v0 }
  0xed   : > { %1192 = vst [vmem:[%s1820_s29 + $0x748] sm:$0xff] %v808_v51  ;;  %1193 = vst [vmem:[%s1820_s29 + $0x750] sm:$0xff] %v809_v52  ;;  %v3284_v34 = vld [vmem:[%s1758_s27 + $0x8b8] sm:$0xff]  ;;  %v3299_v39 = vld [vmem:[%s1758_s27 + $0x8c0] sm:$0xff]  ;;  %v839_v51 = vmul.f32 %v1784_v22, %v3203_v6  ;;  %v840_v52 = vmul.f32 %v1784_v22, %v3206_v7  ;;  %v850_v6 = vmul.f32 %v1784_v22, %v3260_v26 }
  0xee   : > { %1194 = vst [vmem:[%s1820_s29 + $0x758] sm:$0xff] %v810_v53  ;;  %1195 = vst [vmem:[%s1820_s29 + $0x760] sm:$0xff] %v811_v58  ;;  %v3302_v40 = vld [vmem:[%s1758_s27 + $0x8c8] sm:$0xff]  ;;  %v3305_v41 = vld [vmem:[%s1758_s27 + $0x8d0] sm:$0xff]  ;;  %v841_v53 = vmul.f32 %v1784_v22, %v3209_v8 }
  0xef   : > { %1196 = vst [vmem:[%s1820_s29 + $0x768] sm:$0xff] %v812_v59  ;;  %1197 = vst [vmem:[%s1820_s29 + $0x770] sm:$0xff] %v813_v60  ;;  %v3308_v42 = vld [vmem:[%s1758_s27 + $0x8d8] sm:$0xff]  ;;  %v3323_v47 = vld [vmem:[%s1758_s27 + $0x8e0] sm:$0xff]  ;;  %v843_v59 = vmul.f32 %v1784_v22, %v3227_v14  ;;  %v844_v60 = vmul.f32 %v1784_v22, %v3230_v15  ;;  %v854_v14 = vmul.f32 %v1784_v22, %v3284_v34 }
  0xf0   : > { %1198 = vst [vmem:[%s1820_s29 + $0x778] sm:$0xff] %v814_v61  ;;  %1199 = vst [vmem:[%s1820_s29 + $0x780] sm:$0xff] %v815_v2  ;;  %v3326_v48 = vld [vmem:[%s1758_s27 + $0x8e8] sm:$0xff]  ;;  %v3329_v49 = vld [vmem:[%s1758_s27 + $0x8f0] sm:$0xff]  ;;  %v845_v61 = vmul.f32 %v1784_v22, %v3233_v16 }
  0xf1   : > { %1200 = vst [vmem:[%s1820_s29 + $0x788] sm:$0xff] %v816_v3  ;;  %1201 = vst [vmem:[%s1820_s29 + $0x790] sm:$0xff] %v817_v4  ;;  %v3332_v50 = vld [vmem:[%s1758_s27 + $0x8f8] sm:$0xff]  ;;  %v3347_v55 = vld [vmem:[%s1758_s27 + $0x900] sm:$0xff]  ;;  %v847_v3 = vmul.f32 %v1784_v22, %v3251_v23  ;;  %v848_v4 = vmul.f32 %v1784_v22, %v3254_v24  ;;  %v858_v23 = vmul.f32 %v1784_v22, %v3308_v42 }
  0xf2   : > { %1202 = vst [vmem:[%s1820_s29 + $0x798] sm:$0xff] %v818_v5  ;;  %1203 = vst [vmem:[%s1820_s29 + $0x7a0] sm:$0xff] %v819_v10  ;;  %v3350_v56 = vld [vmem:[%s1758_s27 + $0x908] sm:$0xff]  ;;  %v3353_v57 = vld [vmem:[%s1758_s27 + $0x910] sm:$0xff]  ;;  %v849_v5 = vmul.f32 %v1784_v22, %v3257_v25 }
  0xf3   : > { %1204 = vst [vmem:[%s1820_s29 + $0x7a8] sm:$0xff] %v820_v11  ;;  %1205 = vst [vmem:[%s1820_s29 + $0x7b0] sm:$0xff] %v821_v12  ;;  %v3356_v58 = vld [vmem:[%s1758_s27 + $0x918] sm:$0xff]  ;;  %v3371_v63 = vld [vmem:[%s1758_s27 + $0x920] sm:$0xff]  ;;  %v851_v11 = vmul.f32 %v1784_v22, %v3275_v31  ;;  %v852_v12 = vmul.f32 %v1784_v22, %v3278_v32  ;;  %v862_v31 = vmul.f32 %v1784_v22, %v3332_v50 }
  0xf4   : > { %1206 = vst [vmem:[%s1820_s29 + $0x7b8] sm:$0xff] %v822_v13  ;;  %1207 = vst [vmem:[%s1820_s29 + $0x7c0] sm:$0xff] %v823_v18  ;;  %v3374_v0 = vld [vmem:[%s1758_s27 + $0x928] sm:$0xff]  ;;  %v3377_v1 = vld [vmem:[%s1758_s27 + $0x930] sm:$0xff]  ;;  %v853_v13 = vmul.f32 %v1784_v22, %v3281_v33 }
  0xf5   : > { %1208 = vst [vmem:[%s1820_s29 + $0x7c8] sm:$0xff] %v824_v19  ;;  %1209 = vst [vmem:[%s1820_s29 + $0x7d0] sm:$0xff] %v825_v20  ;;  %v3380_v2 = vld [vmem:[%s1758_s27 + $0x938] sm:$0xff]  ;;  %v3395_v7 = vld [vmem:[%s1758_s27 + $0x940] sm:$0xff]  ;;  %v855_v19 = vmul.f32 %v1784_v22, %v3299_v39  ;;  %v856_v20 = vmul.f32 %v1784_v22, %v3302_v40  ;;  %v866_v39 = vmul.f32 %v1784_v22, %v3356_v58 }
  0xf6   : > { %1210 = vst [vmem:[%s1820_s29 + $0x7d8] sm:$0xff] %v826_v21  ;;  %1211 = vst [vmem:[%s1820_s29 + $0x7e0] sm:$0xff] %v827_v27  ;;  %v3398_v8 = vld [vmem:[%s1758_s27 + $0x948] sm:$0xff]  ;;  %v3401_v9 = vld [vmem:[%s1758_s27 + $0x950] sm:$0xff]  ;;  %v857_v21 = vmul.f32 %v1784_v22, %v3305_v41 }
  0xf7   : > { %1212 = vst [vmem:[%s1820_s29 + $0x7e8] sm:$0xff] %v828_v28  ;;  %1213 = vst [vmem:[%s1820_s29 + $0x7f0] sm:$0xff] %v829_v29  ;;  %v3404_v10 = vld [vmem:[%s1758_s27 + $0x958] sm:$0xff]  ;;  %v3419_v15 = vld [vmem:[%s1758_s27 + $0x960] sm:$0xff]  ;;  %v859_v28 = vmul.f32 %v1784_v22, %v3323_v47  ;;  %v860_v29 = vmul.f32 %v1784_v22, %v3326_v48  ;;  %v870_v47 = vmul.f32 %v1784_v22, %v3380_v2 }
  0xf8   : > { %1214 = vst [vmem:[%s1820_s29 + $0x7f8] sm:$0xff] %v830_v30  ;;  %1215 = vst [vmem:[%s1820_s29 + $0x800] sm:$0xff] %v831_v35  ;;  %v3422_v16 = vld [vmem:[%s1758_s27 + $0x968] sm:$0xff]  ;;  %v3425_v17 = vld [vmem:[%s1758_s27 + $0x970] sm:$0xff]  ;;  %v861_v30 = vmul.f32 %v1784_v22, %v3329_v49 }
  0xf9   : > { %1216 = vst [vmem:[%s1820_s29 + $0x808] sm:$0xff] %v832_v36  ;;  %1217 = vst [vmem:[%s1820_s29 + $0x810] sm:$0xff] %v833_v37  ;;  %v3428_v18 = vld [vmem:[%s1758_s27 + $0x978] sm:$0xff]  ;;  %v3443_v24 = vld [vmem:[%s1758_s27 + $0x980] sm:$0xff]  ;;  %v863_v36 = vmul.f32 %v1784_v22, %v3347_v55  ;;  %v864_v37 = vmul.f32 %v1784_v22, %v3350_v56  ;;  %v874_v55 = vmul.f32 %v1784_v22, %v3404_v10 }
  0xfa   : > { %1218 = vst [vmem:[%s1820_s29 + $0x818] sm:$0xff] %v834_v38  ;;  %1219 = vst [vmem:[%s1820_s29 + $0x820] sm:$0xff] %v835_v43  ;;  %v3446_v25 = vld [vmem:[%s1758_s27 + $0x988] sm:$0xff]  ;;  %v3449_v26 = vld [vmem:[%s1758_s27 + $0x990] sm:$0xff]  ;;  %v865_v38 = vmul.f32 %v1784_v22, %v3353_v57 }
  0xfb   : > { %1220 = vst [vmem:[%s1820_s29 + $0x828] sm:$0xff] %v836_v44  ;;  %1221 = vst [vmem:[%s1820_s29 + $0x830] sm:$0xff] %v837_v45  ;;  %v3452_v27 = vld [vmem:[%s1758_s27 + $0x998] sm:$0xff]  ;;  %v3467_v32 = vld [vmem:[%s1758_s27 + $0x9a0] sm:$0xff]  ;;  %v867_v44 = vmul.f32 %v1784_v22, %v3371_v63  ;;  %v868_v45 = vmul.f32 %v1784_v22, %v3374_v0  ;;  %v878_v63 = vmul.f32 %v1784_v22, %v3428_v18 }
  0xfc   : > { %1222 = vst [vmem:[%s1820_s29 + $0x838] sm:$0xff] %v838_v46  ;;  %1223 = vst [vmem:[%s1820_s29 + $0x840] sm:$0xff] %v839_v51  ;;  %v3470_v33 = vld [vmem:[%s1758_s27 + $0x9a8] sm:$0xff]  ;;  %v3473_v34 = vld [vmem:[%s1758_s27 + $0x9b0] sm:$0xff]  ;;  %v869_v46 = vmul.f32 %v1784_v22, %v3377_v1 }
  0xfd   : > { %1224 = vst [vmem:[%s1820_s29 + $0x848] sm:$0xff] %v840_v52  ;;  %1225 = vst [vmem:[%s1820_s29 + $0x850] sm:$0xff] %v841_v53  ;;  %v3476_v35 = vld [vmem:[%s1758_s27 + $0x9b8] sm:$0xff]  ;;  %v3491_v40 = vld [vmem:[%s1758_s27 + $0x9c0] sm:$0xff]  ;;  %v871_v52 = vmul.f32 %v1784_v22, %v3395_v7  ;;  %v872_v53 = vmul.f32 %v1784_v22, %v3398_v8  ;;  %v882_v7 = vmul.f32 %v1784_v22, %v3452_v27 }
  0xfe   : > { %1226 = vst [vmem:[%s1820_s29 + $0x858] sm:$0xff] %v842_v54  ;;  %1227 = vst [vmem:[%s1820_s29 + $0x860] sm:$0xff] %v843_v59  ;;  %v3494_v41 = vld [vmem:[%s1758_s27 + $0x9c8] sm:$0xff]  ;;  %v3497_v42 = vld [vmem:[%s1758_s27 + $0x9d0] sm:$0xff]  ;;  %v873_v54 = vmul.f32 %v1784_v22, %v3401_v9 }
  0xff   : > { %1228 = vst [vmem:[%s1820_s29 + $0x868] sm:$0xff] %v844_v60  ;;  %1229 = vst [vmem:[%s1820_s29 + $0x870] sm:$0xff] %v845_v61  ;;  %v3500_v43 = vld [vmem:[%s1758_s27 + $0x9d8] sm:$0xff]  ;;  %v3515_v48 = vld [vmem:[%s1758_s27 + $0x9e0] sm:$0xff]  ;;  %v875_v60 = vmul.f32 %v1784_v22, %v3419_v15  ;;  %v876_v61 = vmul.f32 %v1784_v22, %v3422_v16  ;;  %v886_v15 = vmul.f32 %v1784_v22, %v3476_v35 }
 0x100   : > { %1230 = vst [vmem:[%s1820_s29 + $0x878] sm:$0xff] %v846_v62  ;;  %1231 = vst [vmem:[%s1820_s29 + $0x880] sm:$0xff] %v847_v3  ;;  %v3518_v49 = vld [vmem:[%s1758_s27 + $0x9e8] sm:$0xff]  ;;  %v3521_v50 = vld [vmem:[%s1758_s27 + $0x9f0] sm:$0xff]  ;;  %v877_v62 = vmul.f32 %v1784_v22, %v3425_v17 }
 0x101   : > { %1232 = vst [vmem:[%s1820_s29 + $0x888] sm:$0xff] %v848_v4  ;;  %1233 = vst [vmem:[%s1820_s29 + $0x890] sm:$0xff] %v849_v5  ;;  %v3524_v51 = vld [vmem:[%s1758_s27 + $0x9f8] sm:$0xff]  ;;  %v3539_v56 = vld [vmem:[%s1758_s27 + $0xa00] sm:$0xff]  ;;  %v879_v4 = vmul.f32 %v1784_v22, %v3443_v24  ;;  %v880_v5 = vmul.f32 %v1784_v22, %v3446_v25  ;;  %v890_v24 = vmul.f32 %v1784_v22, %v3500_v43 }
 0x102   : > { %1234 = vst [vmem:[%s1820_s29 + $0x898] sm:$0xff] %v850_v6  ;;  %1235 = vst [vmem:[%s1820_s29 + $0x8a0] sm:$0xff] %v851_v11  ;;  %v3542_v57 = vld [vmem:[%s1758_s27 + $0xa08] sm:$0xff]  ;;  %v3545_v58 = vld [vmem:[%s1758_s27 + $0xa10] sm:$0xff]  ;;  %v881_v6 = vmul.f32 %v1784_v22, %v3449_v26 }
 0x103   : > { %1236 = vst [vmem:[%s1820_s29 + $0x8a8] sm:$0xff] %v852_v12  ;;  %1237 = vst [vmem:[%s1820_s29 + $0x8b0] sm:$0xff] %v853_v13  ;;  %v3548_v59 = vld [vmem:[%s1758_s27 + $0xa18] sm:$0xff]  ;;  %v3563_v0 = vld [vmem:[%s1758_s27 + $0xa20] sm:$0xff]  ;;  %v883_v12 = vmul.f32 %v1784_v22, %v3467_v32  ;;  %v884_v13 = vmul.f32 %v1784_v22, %v3470_v33  ;;  %v894_v32 = vmul.f32 %v1784_v22, %v3524_v51 }
 0x104   : > { %1238 = vst [vmem:[%s1820_s29 + $0x8b8] sm:$0xff] %v854_v14  ;;  %1239 = vst [vmem:[%s1820_s29 + $0x8c0] sm:$0xff] %v855_v19  ;;  %v3566_v1 = vld [vmem:[%s1758_s27 + $0xa28] sm:$0xff]  ;;  %v3569_v2 = vld [vmem:[%s1758_s27 + $0xa30] sm:$0xff]  ;;  %v885_v14 = vmul.f32 %v1784_v22, %v3473_v34 }
 0x105   : > { %1240 = vst [vmem:[%s1820_s29 + $0x8c8] sm:$0xff] %v856_v20  ;;  %1241 = vst [vmem:[%s1820_s29 + $0x8d0] sm:$0xff] %v857_v21  ;;  %v3572_v3 = vld [vmem:[%s1758_s27 + $0xa38] sm:$0xff]  ;;  %v3587_v8 = vld [vmem:[%s1758_s27 + $0xa40] sm:$0xff]  ;;  %v887_v20 = vmul.f32 %v1784_v22, %v3491_v40  ;;  %v888_v21 = vmul.f32 %v1784_v22, %v3494_v41  ;;  %v898_v40 = vmul.f32 %v1784_v22, %v3548_v59 }
 0x106   : > { %1242 = vst [vmem:[%s1820_s29 + $0x8d8] sm:$0xff] %v858_v23  ;;  %1243 = vst [vmem:[%s1820_s29 + $0x8e0] sm:$0xff] %v859_v28  ;;  %v3590_v9 = vld [vmem:[%s1758_s27 + $0xa48] sm:$0xff]  ;;  %v3593_v10 = vld [vmem:[%s1758_s27 + $0xa50] sm:$0xff]  ;;  %v889_v23 = vmul.f32 %v1784_v22, %v3497_v42 }
 0x107   : > { %1244 = vst [vmem:[%s1820_s29 + $0x8e8] sm:$0xff] %v860_v29  ;;  %1245 = vst [vmem:[%s1820_s29 + $0x8f0] sm:$0xff] %v861_v30  ;;  %v3596_v11 = vld [vmem:[%s1758_s27 + $0xa58] sm:$0xff]  ;;  %v3611_v16 = vld [vmem:[%s1758_s27 + $0xa60] sm:$0xff]  ;;  %v891_v29 = vmul.f32 %v1784_v22, %v3515_v48  ;;  %v892_v30 = vmul.f32 %v1784_v22, %v3518_v49  ;;  %v902_v48 = vmul.f32 %v1784_v22, %v3572_v3 }
 0x108   : > { %1246 = vst [vmem:[%s1820_s29 + $0x8f8] sm:$0xff] %v862_v31  ;;  %1247 = vst [vmem:[%s1820_s29 + $0x900] sm:$0xff] %v863_v36  ;;  %v3614_v17 = vld [vmem:[%s1758_s27 + $0xa68] sm:$0xff]  ;;  %v3617_v18 = vld [vmem:[%s1758_s27 + $0xa70] sm:$0xff]  ;;  %v893_v31 = vmul.f32 %v1784_v22, %v3521_v50 }
 0x109   : > { %1248 = vst [vmem:[%s1820_s29 + $0x908] sm:$0xff] %v864_v37  ;;  %1249 = vst [vmem:[%s1820_s29 + $0x910] sm:$0xff] %v865_v38  ;;  %v3620_v19 = vld [vmem:[%s1758_s27 + $0xa78] sm:$0xff]  ;;  %v3635_v25 = vld [vmem:[%s1758_s27 + $0xa80] sm:$0xff]  ;;  %v895_v37 = vmul.f32 %v1784_v22, %v3539_v56  ;;  %v896_v38 = vmul.f32 %v1784_v22, %v3542_v57  ;;  %v906_v56 = vmul.f32 %v1784_v22, %v3596_v11 }
 0x10a   : > { %1250 = vst [vmem:[%s1820_s29 + $0x918] sm:$0xff] %v866_v39  ;;  %1251 = vst [vmem:[%s1820_s29 + $0x920] sm:$0xff] %v867_v44  ;;  %v3638_v26 = vld [vmem:[%s1758_s27 + $0xa88] sm:$0xff]  ;;  %v3641_v27 = vld [vmem:[%s1758_s27 + $0xa90] sm:$0xff]  ;;  %v897_v39 = vmul.f32 %v1784_v22, %v3545_v58 }
 0x10b   : > { %1252 = vst [vmem:[%s1820_s29 + $0x928] sm:$0xff] %v868_v45  ;;  %1253 = vst [vmem:[%s1820_s29 + $0x930] sm:$0xff] %v869_v46  ;;  %v3644_v28 = vld [vmem:[%s1758_s27 + $0xa98] sm:$0xff]  ;;  %v3659_v33 = vld [vmem:[%s1758_s27 + $0xaa0] sm:$0xff]  ;;  %v899_v45 = vmul.f32 %v1784_v22, %v3563_v0  ;;  %v900_v46 = vmul.f32 %v1784_v22, %v3566_v1  ;;  %v910_v0 = vmul.f32 %v1784_v22, %v3620_v19 }
 0x10c   : > { %1254 = vst [vmem:[%s1820_s29 + $0x938] sm:$0xff] %v870_v47  ;;  %1255 = vst [vmem:[%s1820_s29 + $0x940] sm:$0xff] %v871_v52  ;;  %v3662_v34 = vld [vmem:[%s1758_s27 + $0xaa8] sm:$0xff]  ;;  %v3665_v35 = vld [vmem:[%s1758_s27 + $0xab0] sm:$0xff]  ;;  %v901_v47 = vmul.f32 %v1784_v22, %v3569_v2 }
 0x10d   : > { %1256 = vst [vmem:[%s1820_s29 + $0x948] sm:$0xff] %v872_v53  ;;  %1257 = vst [vmem:[%s1820_s29 + $0x950] sm:$0xff] %v873_v54  ;;  %v3668_v36 = vld [vmem:[%s1758_s27 + $0xab8] sm:$0xff]  ;;  %v534_v41 = vld [vmem:[%s1758_s27 + $0xac0] sm:$0xff]  ;;  %v903_v53 = vmul.f32 %v1784_v22, %v3587_v8  ;;  %v904_v54 = vmul.f32 %v1784_v22, %v3590_v9  ;;  %v914_v8 = vmul.f32 %v1784_v22, %v3644_v28 }
 0x10e   : > { %1258 = vst [vmem:[%s1820_s29 + $0x958] sm:$0xff] %v874_v55  ;;  %1259 = vst [vmem:[%s1820_s29 + $0x960] sm:$0xff] %v875_v60  ;;  %v535_v42 = vld [vmem:[%s1758_s27 + $0xac8] sm:$0xff]  ;;  %v536_v43 = vld [vmem:[%s1758_s27 + $0xad0] sm:$0xff]  ;;  %v905_v55 = vmul.f32 %v1784_v22, %v3593_v10  ;;  %v919_v19 = vmul.f32 %v1784_v22, %v534_v41 }
 0x10f   : > { %1260 = vst [vmem:[%s1820_s29 + $0x968] sm:$0xff] %v876_v61  ;;  %1261 = vst [vmem:[%s1820_s29 + $0x970] sm:$0xff] %v877_v62  ;;  %v537_v44 = vld [vmem:[%s1758_s27 + $0xad8] sm:$0xff]  ;;  %v538_v49 = vld [vmem:[%s1758_s27 + $0xae0] sm:$0xff]  ;;  %v907_v61 = vmul.f32 %v1784_v22, %v3611_v16  ;;  %v908_v62 = vmul.f32 %v1784_v22, %v3614_v17 }
 0x110   : > { %1262 = vst [vmem:[%s1820_s29 + $0x978] sm:$0xff] %v878_v63  ;;  %1263 = vst [vmem:[%s1820_s29 + $0x980] sm:$0xff] %v879_v4  ;;  %v539_v50 = vld [vmem:[%s1758_s27 + $0xae8] sm:$0xff]  ;;  %v540_v51 = vld [vmem:[%s1758_s27 + $0xaf0] sm:$0xff]  ;;  %v909_v63 = vmul.f32 %v1784_v22, %v3617_v18 }
 0x111   : > { %1264 = vst [vmem:[%s1820_s29 + $0x988] sm:$0xff] %v880_v5  ;;  %1265 = vst [vmem:[%s1820_s29 + $0x990] sm:$0xff] %v881_v6  ;;  %v541_v52 = vld [vmem:[%s1758_s27 + $0xaf8] sm:$0xff]  ;;  %v542_v57 = vld [vmem:[%s1758_s27 + $0xb00] sm:$0xff]  ;;  %v911_v5 = vmul.f32 %v1784_v22, %v3635_v25  ;;  %v912_v6 = vmul.f32 %v1784_v22, %v3638_v26  ;;  %v924_v28 = vmul.f32 %v1784_v22, %v539_v50 }
 0x112   : > { %1266 = vst [vmem:[%s1820_s29 + $0x998] sm:$0xff] %v882_v7  ;;  %1267 = vst [vmem:[%s1820_s29 + $0x9a0] sm:$0xff] %v883_v12  ;;  %v543_v58 = vld [vmem:[%s1758_s27 + $0xb08] sm:$0xff]  ;;  %v544_v59 = vld [vmem:[%s1758_s27 + $0xb10] sm:$0xff]  ;;  %v913_v7 = vmul.f32 %v1784_v22, %v3641_v27  ;;  %v915_v12 = vmul.f32 %v1784_v22, %v3659_v33  ;;  %v923_v27 = vmul.f32 %v1784_v22, %v538_v49 }
 0x113   : > { %1268 = vst [vmem:[%s1820_s29 + $0x9a8] sm:$0xff] %v884_v13  ;;  %1269 = vst [vmem:[%s1820_s29 + $0x9b0] sm:$0xff] %v885_v14  ;;  %v545_v60 = vld [vmem:[%s1758_s27 + $0xb18] sm:$0xff]  ;;  %v546_v1 = vld [vmem:[%s1758_s27 + $0xb20] sm:$0xff]  ;;  %v916_v13 = vmul.f32 %v1784_v22, %v3662_v34  ;;  %v917_v14 = vmul.f32 %v1784_v22, %v3665_v35  ;;  %v927_v34 = vmul.f32 %v1784_v22, %v542_v57 }
 0x114   : > { %1270 = vst [vmem:[%s1820_s29 + $0x9b8] sm:$0xff] %v886_v15  ;;  %1271 = vst [vmem:[%s1820_s29 + $0x9c0] sm:$0xff] %v887_v20  ;;  %v547_v2 = vld [vmem:[%s1758_s27 + $0xb28] sm:$0xff]  ;;  %v548_v3 = vld [vmem:[%s1758_s27 + $0xb30] sm:$0xff]  ;;  %v918_v15 = vmul.f32 %v1784_v22, %v3668_v36  ;;  %v920_v20 = vmul.f32 %v1784_v22, %v535_v42  ;;  %v928_v35 = vmul.f32 %v1784_v22, %v543_v58 }
 0x115   : > { %1272 = vst [vmem:[%s1820_s29 + $0x9c8] sm:$0xff] %v888_v21  ;;  %1273 = vst [vmem:[%s1820_s29 + $0x9d0] sm:$0xff] %v889_v23  ;;  %v549_v4 = vld [vmem:[%s1758_s27 + $0xb38] sm:$0xff]  ;;  %v550_v9 = vld [vmem:[%s1758_s27 + $0xb40] sm:$0xff]  ;;  %v921_v21 = vmul.f32 %v1784_v22, %v536_v43  ;;  %v922_v23 = vmul.f32 %v1784_v22, %v537_v44  ;;  %v929_v36 = vmul.f32 %v1784_v22, %v544_v59 }
 0x116   : > { %1274 = vst [vmem:[%s1820_s29 + $0x9d8] sm:$0xff] %v890_v24  ;;  %1275 = vst [vmem:[%s1820_s29 + $0x9e0] sm:$0xff] %v891_v29  ;;  %v551_v10 = vld [vmem:[%s1758_s27 + $0xb48] sm:$0xff]  ;;  %v552_v11 = vld [vmem:[%s1758_s27 + $0xb50] sm:$0xff]  ;;  %v925_v29 = vmul.f32 %v1784_v22, %v540_v51  ;;  %v931_v41 = vmul.f32 %v1784_v22, %v546_v1  ;;  %v932_v42 = vmul.f32 %v1784_v22, %v547_v2 }
 0x117   : > { %1276 = vst [vmem:[%s1820_s29 + $0x9e8] sm:$0xff] %v892_v30  ;;  %1277 = vst [vmem:[%s1820_s29 + $0x9f0] sm:$0xff] %v893_v31  ;;  %v553_v16 = vld [vmem:[%s1758_s27 + $0xb58] sm:$0xff]  ;;  %v554_v17 = vld [vmem:[%s1758_s27 + $0xb60] sm:$0xff]  ;;  %v926_v30 = vmul.f32 %v1784_v22, %v541_v52  ;;  %v933_v43 = vmul.f32 %v1784_v22, %v548_v3  ;;  %v934_v44 = vmul.f32 %v1784_v22, %v549_v4 }
 0x118   : > { %1278 = vst [vmem:[%s1820_s29 + $0x9f8] sm:$0xff] %v894_v32  ;;  %1279 = vst [vmem:[%s1820_s29 + $0xa00] sm:$0xff] %v895_v37  ;;  %v555_v18 = vld [vmem:[%s1758_s27 + $0xb68] sm:$0xff]  ;;  %v556_v24 = vld [vmem:[%s1758_s27 + $0xb70] sm:$0xff]  ;;  %v930_v37 = vmul.f32 %v1784_v22, %v545_v60  ;;  %v936_v49 = vmul.f32 %v1784_v22, %v551_v10  ;;  %v937_v50 = vmul.f32 %v1784_v22, %v552_v11 }
 0x119   : > { %1280 = vst [vmem:[%s1820_s29 + $0xa08] sm:$0xff] %v896_v38  ;;  %1281 = vst [vmem:[%s1820_s29 + $0xa10] sm:$0xff] %v897_v39  ;;  %v557_v25 = vld [vmem:[%s1758_s27 + $0xb78] sm:$0xff]  ;;  %v558_v26 = vld [vmem:[%s1758_s27 + $0xb80] sm:$0xff]  ;;  %v938_v51 = vmul.f32 %v1784_v22, %v553_v16  ;;  %v941_v57 = vmul.f32 %v1784_v22, %v556_v24 }
 0x11a   : > { %1282 = vst [vmem:[%s1820_s29 + $0xa18] sm:$0xff] %v898_v40  ;;  %1283 = vst [vmem:[%s1820_s29 + $0xa20] sm:$0xff] %v899_v45  ;;  %v559_v31 = vld [vmem:[%s1758_s27 + $0xb88] sm:$0xff]  ;;  %v560_v32 = vld [vmem:[%s1758_s27 + $0xb90] sm:$0xff]  ;;  %v942_v58 = vmul.f32 %v1784_v22, %v557_v25 }
 0x11b   : > { %1284 = vst [vmem:[%s1820_s29 + $0xa28] sm:$0xff] %v900_v46  ;;  %1285 = vst [vmem:[%s1820_s29 + $0xa30] sm:$0xff] %v901_v47  ;;  %v561_v33 = vld [vmem:[%s1758_s27 + $0xb98] sm:$0xff]  ;;  %v562_v38 = vld [vmem:[%s1758_s27 + $0xba0] sm:$0xff] }
 0x11c   : > { %1286 = vst [vmem:[%s1820_s29 + $0xa38] sm:$0xff] %v902_v48  ;;  %1287 = vst [vmem:[%s1820_s29 + $0xa40] sm:$0xff] %v903_v53  ;;  %v563_v39 = vld [vmem:[%s1758_s27 + $0xba8] sm:$0xff]  ;;  %v564_v40 = vld [vmem:[%s1758_s27 + $0xbb0] sm:$0xff]  ;;  %v935_v48 = vmul.f32 %v1784_v22, %v550_v9  ;;  %v946_v1 = vmul.f32 %v1784_v22, %v561_v33  ;;  %v947_v2 = vmul.f32 %v1784_v22, %v562_v38 }
 0x11d   : > { %1288 = vst [vmem:[%s1820_s29 + $0xa48] sm:$0xff] %v904_v54  ;;  %1289 = vst [vmem:[%s1820_s29 + $0xa50] sm:$0xff] %v905_v55  ;;  %v565_v45 = vld [vmem:[%s1758_s27 + $0xbb8] sm:$0xff]  ;;  %v566_v46 = vld [vmem:[%s1758_s27 + $0xbc0] sm:$0xff]  ;;  %v939_v55 = vmul.f32 %v1784_v22, %v554_v17  ;;  %v948_v3 = vmul.f32 %v1784_v22, %v563_v39  ;;  %v949_v4 = vmul.f32 %v1784_v22, %v564_v40 }
 0x11e   : > { %1290 = vst [vmem:[%s1820_s29 + $0xa58] sm:$0xff] %v906_v56  ;;  %1291 = vst [vmem:[%s1820_s29 + $0xa60] sm:$0xff] %v907_v61  ;;  %v567_v47 = vld [vmem:[%s1758_s27 + $0xbc8] sm:$0xff]  ;;  %v568_v52 = vld [vmem:[%s1758_s27 + $0xbd0] sm:$0xff]  ;;  %v940_v56 = vmul.f32 %v1784_v22, %v555_v18 }
 0x11f   : > { %1292 = vst [vmem:[%s1820_s29 + $0xa68] sm:$0xff] %v908_v62  ;;  %1293 = vst [vmem:[%s1820_s29 + $0xa70] sm:$0xff] %v909_v63  ;;  %v569_v53 = vld [vmem:[%s1758_s27 + $0xbd8] sm:$0xff]  ;;  %v570_v54 = vld [vmem:[%s1758_s27 + $0xbe0] sm:$0xff]  ;;  %v943_v62 = vmul.f32 %v1784_v22, %v558_v26  ;;  %v944_v63 = vmul.f32 %v1784_v22, %v559_v31 }
 0x120   : > { %1294 = vst [vmem:[%s1820_s29 + $0xa78] sm:$0xff] %v910_v0  ;;  %1295 = vst [vmem:[%s1820_s29 + $0xa80] sm:$0xff] %v911_v5  ;;  %v571_v59 = vld [vmem:[%s1758_s27 + $0xbe8] sm:$0xff]  ;;  %v572_v60 = vld [vmem:[%s1758_s27 + $0xbf0] sm:$0xff]  ;;  %v945_v0 = vmul.f32 %v1784_v22, %v560_v32  ;;  %v950_v5 = vmul.f32 %v1784_v22, %v565_v45  ;;  %v954_v9 = vmul.f32 %v1784_v22, %v569_v53 }
 0x121   : > { %1296 = vst [vmem:[%s1820_s29 + $0xa88] sm:$0xff] %v912_v6  ;;  %1297 = vst [vmem:[%s1820_s29 + $0xa90] sm:$0xff] %v913_v7  ;;  %v573_v61 = vld [vmem:[%s1758_s27 + $0xbf8] sm:$0xff]  ;;  %v951_v6 = vmul.f32 %v1784_v22, %v566_v46  ;;  %v952_v7 = vmul.f32 %v1784_v22, %v567_v47  ;;  %v955_v10 = vmul.f32 %v1784_v22, %v570_v54 }
 0x122   : > { %1298 = vst [vmem:[%s1820_s29 + $0xa98] sm:$0xff] %v914_v8  ;;  %1299 = vst [vmem:[%s1820_s29 + $0xaa0] sm:$0xff] %v915_v12  ;;  %v953_v8 = vmul.f32 %v1784_v22, %v568_v52  ;;  %v956_v11 = vmul.f32 %v1784_v22, %v571_v59  ;;  %v957_v12 = vmul.f32 %v1784_v22, %v572_v60 }
 0x123   : > { %1300 = vst [vmem:[%s1820_s29 + $0xaa8] sm:$0xff] %v916_v13  ;;  %1301 = vst [vmem:[%s1820_s29 + $0xab0] sm:$0xff] %v917_v14  ;;  %v958_v13 = vmul.f32 %v1784_v22, %v573_v61 }
 0x124   : > { %1302 = vst [vmem:[%s1820_s29 + $0xab8] sm:$0xff] %v918_v15  ;;  %1303 = vst [vmem:[%s1820_s29 + $0xac0] sm:$0xff] %v919_v19 }
 0x125   : > { %1304 = vst [vmem:[%s1820_s29 + $0xac8] sm:$0xff] %v920_v20  ;;  %1305 = vst [vmem:[%s1820_s29 + $0xad0] sm:$0xff] %v921_v21 }
 0x126   : > { %1306 = vst [vmem:[%s1820_s29 + $0xad8] sm:$0xff] %v922_v23  ;;  %1307 = vst [vmem:[%s1820_s29 + $0xae0] sm:$0xff] %v923_v27 }
 0x127   : > { %1308 = vst [vmem:[%s1820_s29 + $0xae8] sm:$0xff] %v924_v28  ;;  %1309 = vst [vmem:[%s1820_s29 + $0xaf0] sm:$0xff] %v925_v29 }
 0x128   : > { %1310 = vst [vmem:[%s1820_s29 + $0xaf8] sm:$0xff] %v926_v30  ;;  %1311 = vst [vmem:[%s1820_s29 + $0xb00] sm:$0xff] %v927_v34 }
 0x129   : > { %1312 = vst [vmem:[%s1820_s29 + $0xb08] sm:$0xff] %v928_v35  ;;  %1313 = vst [vmem:[%s1820_s29 + $0xb10] sm:$0xff] %v929_v36 }
 0x12a   : > { %1314 = vst [vmem:[%s1820_s29 + $0xb18] sm:$0xff] %v930_v37  ;;  %1315 = vst [vmem:[%s1820_s29 + $0xb20] sm:$0xff] %v931_v41 }
 0x12b   : > { %1316 = vst [vmem:[%s1820_s29 + $0xb28] sm:$0xff] %v932_v42  ;;  %1317 = vst [vmem:[%s1820_s29 + $0xb30] sm:$0xff] %v933_v43 }
 0x12c   : > { %1318 = vst [vmem:[%s1820_s29 + $0xb38] sm:$0xff] %v934_v44  ;;  %1319 = vst [vmem:[%s1820_s29 + $0xb40] sm:$0xff] %v935_v48 }
 0x12d   : > { %1320 = vst [vmem:[%s1820_s29 + $0xb48] sm:$0xff] %v936_v49  ;;  %1321 = vst [vmem:[%s1820_s29 + $0xb50] sm:$0xff] %v937_v50 }
 0x12e   : > { %1322 = vst [vmem:[%s1820_s29 + $0xb58] sm:$0xff] %v938_v51  ;;  %1323 = vst [vmem:[%s1820_s29 + $0xb60] sm:$0xff] %v939_v55 }
 0x12f   : > { %1324 = vst [vmem:[%s1820_s29 + $0xb68] sm:$0xff] %v940_v56  ;;  %1325 = vst [vmem:[%s1820_s29 + $0xb70] sm:$0xff] %v941_v57 }
 0x130   : > { %1326 = vst [vmem:[%s1820_s29 + $0xb78] sm:$0xff] %v942_v58  ;;  %1327 = vst [vmem:[%s1820_s29 + $0xb80] sm:$0xff] %v943_v62 }
 0x131   : > { %1328 = vst [vmem:[%s1820_s29 + $0xb88] sm:$0xff] %v944_v63  ;;  %1329 = vst [vmem:[%s1820_s29 + $0xb90] sm:$0xff] %v945_v0 }
 0x132   : > { %1330 = vst [vmem:[%s1820_s29 + $0xb98] sm:$0xff] %v946_v1  ;;  %1331 = vst [vmem:[%s1820_s29 + $0xba0] sm:$0xff] %v947_v2 }
 0x133   : > { %1332 = vst [vmem:[%s1820_s29 + $0xba8] sm:$0xff] %v948_v3  ;;  %1333 = vst [vmem:[%s1820_s29 + $0xbb0] sm:$0xff] %v949_v4 }
 0x134   : > { %1334 = vst [vmem:[%s1820_s29 + $0xbb8] sm:$0xff] %v950_v5  ;;  %1335 = vst [vmem:[%s1820_s29 + $0xbc0] sm:$0xff] %v951_v6 }
 0x135   : > { %1336 = vst [vmem:[%s1820_s29 + $0xbc8] sm:$0xff] %v952_v7  ;;  %1337 = vst [vmem:[%s1820_s29 + $0xbd0] sm:$0xff] %v953_v8 }
 0x136   : > { %1338 = vst [vmem:[%s1820_s29 + $0xbd8] sm:$0xff] %v954_v9  ;;  %1339 = vst [vmem:[%s1820_s29 + $0xbe0] sm:$0xff] %v955_v10 }
 0x137   : > { %1340 = vst [vmem:[%s1820_s29 + $0xbe8] sm:$0xff] %v956_v11  ;;  %1341 = vst [vmem:[%s1820_s29 + $0xbf0] sm:$0xff] %v957_v12 }
 0x138   : > { %1342 = vst [vmem:[%s1820_s29 + $0xbf8] sm:$0xff] %v958_v13 }
 0x139   : > { %1575 = shalt.err (!%p1572_p6)
}
 0x13a   : > { %s1576_s0 = scalar_lea.hbm %s3861_s6, 49152  ;;  %s1580_s21 = scalar_lea.hbm %s3931_s2, 98304 }
 0x13b   : > { %p1577_p4 = scmp.ne.s32.totalorder %s3861_s6, %s1576_s0  ;;  %p1581_p13 = scmp.lt.s32.totalorder %s3861_s6, %s3931_s2 }
 0x13c   : > { %p1582_p2 = scmp.lt.s32.totalorder %s1580_s21, %s1576_s0 }
 0x13d   : > { %p1578_p7 = pnand %p1577_p4, %p1719_p9 }
 0x13e   : > { %p1583_p8 = por %p1582_p2, %p1581_p13 }
 0x13f   : > { %p1579_p10 = pneg %p1578_p7 }
 0x141   : > { %p1584_p12 = pnand %p1583_p8, %p1579_p10 }
 0x143   : > { %1587 = shalt.err (!%p1584_p12)
}
 0x144   : > { %s1648_s28 = smov 768   ;;  %s1649_s22 = smov 48  }
 0x145   : > { %1468 = dma.vmem_to_hbm [thread:$0]  (%p1719_p9), %s3865_s3, 49152, %s3861_s6, %s1344_s14, %s1648_s28, %s1648_s28, %s1649_s22  }
 0x146 PF: > { %s1375_s29 = sand.u32 1, %s1622_s11   ;;  %p3937_p0 = scmp.ge.s32.totalorder %s1642_s16, 2 }
 0x147   : > { %s1376_s30 = scalar_lea.sflag [#allocation5], %s1375_s29 }
 0x148   : > { %p1475_p1 = pnand %p3937_p0, %p1726_p11 }
 0x14a   : > { %p1476_p3 = pneg %p1475_p1 }
 0x14c   : > { %1617 = dma.done.wait (%p1476_p3), %s1376_s30, 49152  }
 0x14d   : > { %1619 = vsyncadd (%p1476_p3), %s1376_s30, 4294918144  ;;  %s19_s16 = sadd.s32 1, %s1642_s16   ;;  %s3938_s11 = smov %s1626_s12 }
 0x14e   : > { %p16_p5 = scmp.ge.s32.totalorder %s19_s16, 4   ;;  %s3939_s12 = smov %s1630_s13 }
 0x14f   : > { %s3940_s13 = smov %s1724_s24  ;;  %s3941_s14 = smov %s1638_s15 }
 0x150   : > { %s3942_s15 = smov %s3944_s18  ;;  %18 = sbr.rel (!%p16_p5) target bundleno = 8 (0x8), region = 73 }
 0x155   :  { %1381 = vsyncpa [#allocation4], 1 }
 0x156   :  { %1383 = vsyncpa [#allocation4 + $0x1], 1 }
 0x157   :  { %1384 = vsyncpa [#allocation5], 1 }
 0x158   :  { %1386 = vsyncpa [#allocation5 + $0x1], 1 }

</bundles_post_ra>
